<compile_context>
chip_gen: v7x
topology: tpu7x:2x2x1
jax: 0.10.0
libtpu: 0.0.40
codegen_flags: <defaults>
</compile_context>

<pallas_src>
import functools

import jax
import jax.numpy as jnp
from jax import lax
from jax.experimental import pallas as pl
from jax.experimental.pallas import tpu as pltpu

LANES = 128


def _round_up(x, m):
    return ((x + m - 1) // m) * m


# ---------------------------------------------------------------------------
# Fused ResBlock kernel (stride == 1, odd kernel, Wo % 8 == 0)
# ---------------------------------------------------------------------------
def _resblock_fused_kernel(p_ref, r_ref, w1_ref, w2_ref, sh2_ref, o_ref,
                           y1p_ref, *, k, pad, tr, wo):
    # p_ref  : ((tr+2*pad)*wo, KKC) bf16  conv1 patches (+bias-indicator col)
    # r_ref  : (tr*wo, Cp)          bf16  residual, channels zero-padded to Cp
    # w1_ref : (KKC, Cp)            bf16  conv1 matrix, BN1 scale folded,
    #                                     BN1 shift on the bias row
    # w2_ref : (K*K, Cp, Cp)        bf16  conv2 per-tap weights, BN2 scale folded
    # sh2_ref: (1, Cp)              f32   BN2 shift
    # o_ref  : (tr*wo, Cp)          f32
    # y1p_ref: VMEM (tr+2*pad, wo+2*pad, Cp) f32 scratch (y1 + W-halo)
    trext = tr + 2 * pad
    cp = o_ref.shape[-1]

    # ---- conv1 + BN1 (+shift via bias column) + ReLU : ONE fat MXU matmul ----
    y1 = jnp.dot(p_ref[...], w1_ref[...], preferred_element_type=jnp.float32)
    y1 = jnp.maximum(y1, 0.0).reshape(trext, wo, cp)

    # ---- stage y1 in VMEM: zero only the W-halo columns, interior overwritten
    if pad:
        zcol = jnp.zeros((trext, pad, cp), jnp.float32)
        y1p_ref[:, :pad, :] = zcol
        y1p_ref[:, pad + wo:, :] = zcol
    y1p_ref[:, pad:pad + wo, :] = y1

    # ---- conv2 + BN2 + residual add + final ReLU : K*K per-tap matmuls ------
    acc = None
    for kh in range(k):
        for kw in range(k):
            tap = y1p_ref[kh:kh + tr, kw:kw + wo, :]
            tap = tap.reshape(tr * wo, cp).astype(jnp.bfloat16)
            part = jnp.dot(tap, w2_ref[kh * k + kw],
                           preferred_element_type=jnp.float32)
            acc = part if acc is None else acc + part
    y2 = acc + sh2_ref[...] + r_ref[...].astype(jnp.float32)
    o_ref[...] = jnp.maximum(y2, 0.0).astype(o_ref.dtype)


def resblock_fused(patches, r_flat, w1, w2, sh2, *, n, n_tiles, tr, wo, k, pad):
    trext = tr + 2 * pad
    cp = w2.shape[-1]
    kkc = w1.shape[0]
    kern = functools.partial(_resblock_fused_kernel, k=k, pad=pad, tr=tr, wo=wo)
    return pl.pallas_call(
        kern,
        out_shape=jax.ShapeDtypeStruct((n, n_tiles * tr * wo, cp), jnp.float32),
        grid_spec=pltpu.PrefetchScalarGridSpec(
            num_scalar_prefetch=0,
            grid=(n, n_tiles),
            in_specs=[
                pl.BlockSpec((None, trext * wo, kkc),
                             lambda b, t: (b * n_tiles + t, 0, 0)),
                pl.BlockSpec((None, tr * wo, cp), lambda b, t: (b, t, 0)),
                pl.BlockSpec((kkc, cp), lambda b, t: (0, 0)),
                pl.BlockSpec((k * k, cp, cp), lambda b, t: (0, 0, 0)),
                pl.BlockSpec((1, cp), lambda b, t: (0, 0)),
            ],
            out_specs=pl.BlockSpec((None, tr * wo, cp), lambda b, t: (b, t, 0)),
            scratch_shapes=[
                pltpu.VMEM((trext, wo + 2 * pad, cp), jnp.float32)],
        ),
        compiler_params=pltpu.CompilerParams(
            dimension_semantics=("parallel", "parallel")),
    )(patches, r_flat, w1, w2, sh2)


def _build_conv1_patches(x_nhwc, k, pad, ho, wo, tr, n_tiles, kkc_pad):
    """Per-row-tile conv1 im2col patches with a bias-indicator column.

    Returns (N*n_tiles, (tr+2*pad)*wo, kkc_pad) bf16.  Rows outside the image
    are all-zero (indicator 0), so relu(patches @ W1) is exactly zero there —
    they become conv2's zero padding without any in-kernel masking.
    """
    n = x_nhwc.shape[0]
    xp = jnp.pad(x_nhwc, ((0, 0), (pad, pad), (pad, pad), (0, 0)))
    cols = [xp[:, kh:kh + ho, kw:kw + wo, :]
            for kh in range(k) for kw in range(k)]
    cols.append(jnp.ones((n, ho, wo, 1), x_nhwc.dtype))      # bias indicator
    p = jnp.concatenate(cols, axis=-1)                       # (N, Ho, Wo, KKC+1)
    p = jnp.pad(p, ((0, 0), (pad, n_tiles * tr - ho + pad), (0, 0),
                    (0, kkc_pad - p.shape[-1])))
    # overlapping row tiles: tile t covers padded rows [t*tr, t*tr + tr + 2*pad)
    idx = (jnp.arange(n_tiles) * tr)[:, None] + jnp.arange(tr + 2 * pad)[None, :]
    p = p[:, idx]                                            # (N, T, tr+2p, Wo, KKC)
    return p.reshape(n * n_tiles, (tr + 2 * pad) * wo, kkc_pad).astype(jnp.bfloat16)


# ---------------------------------------------------------------------------
# Fallback for stride != 1: im2col + matmul, residual add + ReLU fused into
# the second matmul.  M is padded to a fixed tile (no whole-array block).
# ---------------------------------------------------------------------------
def _conv_bn_kernel(p_ref, w_ref, sh_ref, *rest, apply_relu, has_residual):
    if has_residual:
        r_ref, o_ref = rest
    else:
        (o_ref,) = rest
    y = jnp.dot(p_ref[...], w_ref[...], preferred_element_type=jnp.float32)
    y = y + sh_ref[...]
    if has_residual:
        y = y + r_ref[...].astype(jnp.float32)
    if apply_relu:
        y = jnp.maximum(y, 0.0)
    o_ref[...] = y.astype(o_ref.dtype)


def _conv_bn(patches, w_mat, shift, residual=None, *, apply_relu):
    m, kd = patches.shape
    co = w_mat.shape[1]
    tm = 256 if m >= 256 else _round_up(m, 8)
    m_pad = _round_up(m, tm)
    if m_pad != m:
        patches = jnp.pad(patches, ((0, m_pad - m), (0, 0)))
        if residual is not None:
            residual = jnp.pad(residual, ((0, m_pad - m), (0, 0)))
    has_res = residual is not None
    kern = functools.partial(_conv_bn_kernel, apply_relu=apply_relu,
                             has_residual=has_res)
    in_specs = [pl.BlockSpec((tm, kd), lambda i: (i, 0)),
                pl.BlockSpec((kd, co), lambda i: (0, 0)),
                pl.BlockSpec((1, co), lambda i: (0, 0))]
    args = [patches, w_mat, shift]
    if has_res:
        in_specs.append(pl.BlockSpec((tm, co), lambda i: (i, 0)))
        args.append(residual)
    # TODO(synk): for very large kd add a K grid axis + VMEM f32 accumulator.
    out = pl.pallas_call(
        kern,
        out_shape=jax.ShapeDtypeStruct((m_pad, co), jnp.float32),
        grid_spec=pltpu.PrefetchScalarGridSpec(
            num_scalar_prefetch=0,
            grid=(m_pad // tm,),
            in_specs=in_specs,
            out_specs=pl.BlockSpec((tm, co), lambda i: (i, 0))),
        compiler_params=pltpu.CompilerParams(
            dimension_semantics=("parallel",)),
    )(*args)
    return out[:m]


def _im2col(xp, k, stride, ho, wo):
    """xp: spatially pre-padded NHWC -> (N*ho*wo, k*k*C), (kh, kw, c) ordering."""
    n, _, _, c = xp.shape
    cols = []
    for kh in range(k):
        for kw in range(k):
            cols.append(xp[:, kh:kh + ho * stride:stride,
                           kw:kw + wo * stride:stride, :])
    return jnp.concatenate(cols, axis=-1).reshape(n * ho * wo, k * k * c)


def _resblock_im2col(x_pad, r_pad, params, *, k, stride, pad, dims):
    # The torch module applies `stride` to BOTH convs; this path mirrors that.
    n, ho1, wo1, ho2, wo2 = dims
    cp = params["w2"].shape[-1]
    p1 = _im2col(x_pad, k, stride, ho1, wo1).astype(jnp.bfloat16)
    y1 = _conv_bn(p1, params["w1_flat"], params["shift1"], apply_relu=True)
    y1 = y1.reshape(n, ho1, wo1, cp)
    y1 = jnp.pad(y1, ((0, 0), (pad, pad), (pad, pad), (0, 0)))
    p2 = _im2col(y1, k, stride, ho2, wo2).astype(jnp.bfloat16)
    res = r_pad.reshape(n * ho2 * wo2, cp)
    out = _conv_bn(p2, params["w2_flat"], params["shift2"], residual=res,
                   apply_relu=False)
    return out.reshape(n, ho2, wo2, cp)


# ---------------------------------------------------------------------------
# Parameters (raw, torch-like) and kernel-friendly preparation
# ---------------------------------------------------------------------------
def make_resblock_params(key, in_size, out_size, kernel):
    """Raw params mirroring the torch module: Conv2d OIHW weights (bias=False)
    and eval-mode BatchNorm folded to per-channel (scale, shift)."""
    k1, k2 = jax.random.split(key)
    fan1 = in_size * kernel * kernel
    fan2 = out_size * kernel * kernel
    # TODO(synk): torch's default init is kaiming_uniform; normal/sqrt(fan) here.
    w1 = jax.random.normal(k1, (out_size, in_size, kernel, kernel),
                           jnp.float32) / fan1 ** 0.5
    w2 = jax.random.normal(k2, (out_size, out_size, kernel, kernel),
                           jnp.float32) / fan2 ** 0.5
    eps = 1e-5
    gamma = jnp.ones((out_size,), jnp.float32)
    beta = jnp.zeros((out_size,), jnp.float32)
    mean = jnp.zeros((out_size,), jnp.float32)
    var = jnp.ones((out_size,), jnp.float32)
    scale = gamma / jnp.sqrt(var + eps)
    shift = beta - mean * scale
    return {"w1": w1, "w2": w2, "scale1": scale, "shift1": shift,
            "scale2": scale, "shift2": shift}


def prepare_params(raw, kernel):
    """Fold BN scale into the conv weights, pad channels to a lane-dense
    multiple of 128, flatten conv1 into one fat matrix (BN1 shift rides a
    bias-indicator row), keep per-tap conv2 weights, cast to bf16."""
    k = kernel
    cout, cin = raw["w1"].shape[:2]
    cp = max(LANES, _round_up(cout, LANES))
    kkc = k * k * cin
    kkc_pad = _round_up(kkc + 1, LANES)            # +1 bias-indicator column

    w1 = jnp.transpose(raw["w1"], (2, 3, 1, 0)) * raw["scale1"][None, None, None, :]
    w1 = w1.reshape(kkc, cout)                     # ((kh,kw,ci), co)
    w2 = jnp.transpose(raw["w2"], (2, 3, 1, 0)) * raw["scale2"][None, None, None, :]
    w2 = w2.reshape(k * k, cout, cout)             # (tap, ci, co)

    sh1_row = raw["shift1"].reshape(1, cout)
    w1_bias = jnp.concatenate([w1, sh1_row], axis=0)
    w1_bias = jnp.pad(w1_bias, ((0, kkc_pad - (kkc + 1)), (0, cp - cout)))

    w2_taps = jnp.pad(w2, ((0, 0), (0, cp - cout), (0, cp - cout)))

    def pad_shift(s):
        return jnp.pad(s, (0, cp - cout)).reshape(1, cp).astype(jnp.float32)

    return {
        # fused (stride == 1) path:
        "w1": w1_bias.astype(jnp.bfloat16),        # (KKC_pad, Cp)
        "w2": w2_taps.astype(jnp.bfloat16),        # (K*K, Cp, Cp)
        "shift2": pad_shift(raw["shift2"]),
        # stride != 1 fallback (plain im2col) layouts:
        "w1_flat": jnp.pad(w1, ((0, 0), (0, cp - cout))).astype(jnp.bfloat16),
        "shift1": pad_shift(raw["shift1"]),
        "w2_flat": w2_taps.reshape(k * k * cp, cp).astype(jnp.bfloat16),
    }


# ---------------------------------------------------------------------------
# Forward pass (NCHW in, NCHW out) matching the torch module's semantics
# ---------------------------------------------------------------------------
def resblock_forward(inputs1, inputs2, params, *, out_size, kernel, stride):
    k = kernel
    pad = k // 2
    cp = params["w2"].shape[-1]

    n, cin, h, w = inputs1.shape
    ho1 = (h + 2 * pad - k) // stride + 1
    wo1 = (w + 2 * pad - k) // stride + 1
    ho2 = (ho1 + 2 * pad - k) // stride + 1
    wo2 = (wo1 + 2 * pad - k) // stride + 1

    cr = inputs2.shape[1]
    assert inputs2.shape[2:] == (ho2, wo2), "residual spatial shape mismatch"
    assert cr <= cp, "residual has more channels than the padded carry width"
    c_max = max(out_size, cr)

    x = jnp.transpose(inputs1, (0, 2, 3, 1)).astype(jnp.float32)   # NHWC
    r = jnp.transpose(inputs2, (0, 2, 3, 1)).astype(jnp.float32)

    use_fused = (stride == 1) and (k % 2 == 1) and (wo2 % 8 == 0)
    if use_fused:
        # stride==1 & odd k  =>  ho1 == ho2 == h, wo1 == wo2 == w.
        # Row tile sized so tr*wo ~= 128 (f32 accumulator ~16 vregs) and the
        # grid has several steps per core for pipelining.
        tr = max(1, min(ho2, max(1, 128 // wo2)))
        ho_pad = _round_up(ho2, tr)
        n_tiles = ho_pad // tr
        kkc_pad = params["w1"].shape[0]
        patches = _build_conv1_patches(x, k, pad, ho1, wo1, tr, n_tiles, kkc_pad)
        r_p = jnp.pad(r, ((0, 0), (0, ho_pad - ho2), (0, 0), (0, cp - cr)))
        r_flat = r_p.reshape(n, ho_pad * wo2, cp).astype(jnp.bfloat16)
        out = resblock_fused(patches, r_flat, params["w1"], params["w2"],
                             params["shift2"], n=n, n_tiles=n_tiles, tr=tr,
                             wo=wo2, k=k, pad=pad)
        out = out.reshape(n, ho_pad, wo2, cp)[:, :ho2]
    else:
        x_sp = jnp.pad(x, ((0, 0), (pad, pad), (pad, pad), (0, 0)))
        r_pad = jnp.pad(r, ((0, 0), (0, 0), (0, 0), (0, cp - cr)))
        out = _resblock_im2col(x_sp, r_pad, params, k=k, stride=stride, pad=pad,
                               dims=(n, ho1, wo1, ho2, wo2))

    out = out[..., :c_max]
    return jnp.transpose(out, (0, 3, 1, 2))   # back to NCHW


# ---------------------------------------------------------------------------
# Pure-JAX f32 reference (same eval-mode BN) for a numerical sanity check
# ---------------------------------------------------------------------------
def reference_resblock(inputs1, inputs2, raw, kernel, stride):
    pad = kernel // 2
    dn = ("NCHW", "OIHW", "NCHW")

    def conv(x, w):
        return lax.conv_general_dilated(x, w, (stride, stride),
                                        [(pad, pad), (pad, pad)],
                                        dimension_numbers=dn)

    def bn(x, scale, shift):
        return x * scale[None, :, None, None] + shift[None, :, None, None]

    y = jnp.maximum(bn(conv(inputs1, raw["w1"]), raw["scale1"], raw["shift1"]), 0.0)
    y = bn(conv(y, raw["w2"]), raw["scale2"], raw["shift2"])
    z = inputs2
    cx, cr = y.shape[1], z.shape[1]
    if cx < cr:
        y = jnp.concatenate(
            [y, jnp.zeros((y.shape[0], cr - cx) + y.shape[2:], y.dtype)], axis=1)
    elif cr < cx:
        z = jnp.concatenate(
            [z, jnp.zeros((z.shape[0], cx - cr) + z.shape[2:], z.dtype)], axis=1)
    return jnp.maximum(y + z, 0.0)


if __name__ == "__main__":
    # in_size=4, out_size=8, kernel=3, stride=1; inputs (2, 4, 16, 16)
    in_size, out_size, kernel, stride = 4, 8, 3, 1
    key = jax.random.PRNGKey(0)
    kp, ka, kb = jax.random.split(key, 3)
    raw = make_resblock_params(kp, in_size, out_size, kernel)
    params = prepare_params(raw, kernel)

    inputs1 = jax.random.normal(ka, (2, in_size, 16, 16), jnp.float32)
    inputs2 = jax.random.normal(kb, (2, in_size, 16, 16), jnp.float32)

    fwd = jax.jit(functools.partial(resblock_forward, out_size=out_size,
                                    kernel=kernel, stride=stride))
    out = fwd(inputs1, inputs2, params)
    jax.block_until_ready(out)
    assert out.shape == (2, out_size, 16, 16), out.shape

    # Numerical check against a pure-JAX f32 reference.  The kernel feeds the
    # MXU with bf16 patches/weights and carries the residual in bf16, so allow
    # a loose absolute tolerance (outputs are O(1)).
    ref = reference_resblock(inputs1, inputs2, raw, kernel, stride)
    max_err = float(jnp.max(jnp.abs(out - ref)))
    assert max_err < 1e-1, f"max abs err {max_err}"
    print("KERNEL_OK")
</pallas_src>

<mosaic_0001>
module attributes {stable_mosaic.version = 11 : i64} {
  func.func @_resblock_fused_kernel(%arg0: i32, %arg1: i32, %arg2: memref<1x160x128xbf16, #tpu.memory_space<vmem>>, %arg3: memref<1x128x128xbf16, #tpu.memory_space<vmem>>, %arg4: memref<128x128xbf16, #tpu.memory_space<vmem>>, %arg5: memref<9x128x128xbf16, #tpu.memory_space<vmem>>, %arg6: memref<1x128xf32, #tpu.memory_space<vmem>>, %arg7: memref<1x128x128xf32, #tpu.memory_space<vmem>>, %arg8: memref<10x18x128xf32, #tpu.memory_space<vmem>>) attributes {dimension_semantics = [#tpu.dimension_semantics<parallel>, #tpu.dimension_semantics<parallel>], iteration_bounds = array<i64: 2, 2>, scalar_prefetch = 0 : i64, scratch_operands = 1 : i64, tpu.core_type = #tpu.core_type<tc>, window_params = [{transform_indices = @transform_0, window_bounds = array<i64: 1, 160, 128>}, {transform_indices = @transform_1, window_bounds = array<i64: 1, 128, 128>}, {pipeline_mode = #tpu.pipeline_mode<synchronous>, transform_indices = @transform_2, window_bounds = array<i64: 128, 128>}, {pipeline_mode = #tpu.pipeline_mode<synchronous>, transform_indices = @transform_3, window_bounds = array<i64: 9, 128, 128>}, {pipeline_mode = #tpu.pipeline_mode<synchronous>, transform_indices = @transform_4, window_bounds = array<i64: 1, 128>}, {transform_indices = @transform_5, window_bounds = array<i64: 1, 128, 128>}]} {
    %c0 = arith.constant 0 : index
    %c0_0 = arith.constant 0 : index
    %c0_1 = arith.constant 0 : index
    %0 = vector.load %arg2[%c0, %c0_0, %c0_1] : memref<1x160x128xbf16, #tpu.memory_space<vmem>>, vector<1x160x128xbf16>
    %1 = vector.shape_cast %0 : vector<1x160x128xbf16> to vector<160x128xbf16>
    %c0_2 = arith.constant 0 : index
    %c0_3 = arith.constant 0 : index
    %2 = vector.load %arg4[%c0_2, %c0_3] : memref<128x128xbf16, #tpu.memory_space<vmem>>, vector<128x128xbf16>
    %cst = arith.constant dense<0.000000e+00> : vector<160x128xf32>
    %3 = tpu.matmul %1, %2, %cst {dimension_numbers = #tpu.dot_dimension_numbers<[1], [0], [0], [1], [0, 0, 1, 1], [], []>} : vector<160x128xbf16>, vector<128x128xbf16>, vector<160x128xf32> -> vector<160x128xf32>
    %cst_4 = arith.constant 0.000000e+00 : f32
    %4 = vector.broadcast %cst_4 : f32 to vector<160x128xf32>
    %5 = arith.maximumf %3, %4 : vector<160x128xf32>
    %6 = vector.shape_cast %5 : vector<160x128xf32> to vector<10x16x128xf32>
    %cst_5 = arith.constant 0.000000e+00 : f32
    %7 = vector.broadcast %cst_5 : f32 to vector<10x1x128xf32>
    %c0_6 = arith.constant 0 : index
    %c0_7 = arith.constant 0 : index
    %c0_8 = arith.constant 0 : index
    %8 = vector.load %arg8[%c0_6, %c0_7, %c0_8] : memref<10x18x128xf32, #tpu.memory_space<vmem>>, vector<10x1x128xf32>
    tpu.vector_store %arg8[%c0_6, %c0_7, %c0_8], %7 {strides = array<i32>} : memref<10x18x128xf32, #tpu.memory_space<vmem>>, vector<10x1x128xf32>,
    %c0_9 = arith.constant 0 : index
    %c17 = arith.constant 17 : index
    %c0_10 = arith.constant 0 : index
    %9 = vector.load %arg8[%c0_9, %c17, %c0_10] : memref<10x18x128xf32, #tpu.memory_space<vmem>>, vector<10x1x128xf32>
    tpu.vector_store %arg8[%c0_9, %c17, %c0_10], %7 {strides = array<i32>} : memref<10x18x128xf32, #tpu.memory_space<vmem>>, vector<10x1x128xf32>,
    %c0_11 = arith.constant 0 : index
    %c1 = arith.constant 1 : index
    %c0_12 = arith.constant 0 : index
    %10 = vector.load %arg8[%c0_11, %c1, %c0_12] : memref<10x18x128xf32, #tpu.memory_space<vmem>>, vector<10x16x128xf32>
    tpu.vector_store %arg8[%c0_11, %c1, %c0_12], %6 {strides = array<i32>} : memref<10x18x128xf32, #tpu.memory_space<vmem>>, vector<10x16x128xf32>,
    %c0_13 = arith.constant 0 : index
    %c0_14 = arith.constant 0 : index
    %c0_15 = arith.constant 0 : index
    %11 = vector.load %arg8[%c0_13, %c0_14, %c0_15] : memref<10x18x128xf32, #tpu.memory_space<vmem>>, vector<8x16x128xf32>
    %12 = vector.shape_cast %11 : vector<8x16x128xf32> to vector<128x128xf32>
    %13 = arith.truncf %12 : vector<128x128xf32> to vector<128x128xbf16>
    %c0_16 = arith.constant 0 : index
    %c0_17 = arith.constant 0 : index
    %c0_18 = arith.constant 0 : index
    %14 = vector.load %arg5[%c0_16, %c0_17, %c0_18] : memref<9x128x128xbf16, #tpu.memory_space<vmem>>, vector<1x128x128xbf16>
    %15 = vector.shape_cast %14 : vector<1x128x128xbf16> to vector<128x128xbf16>
    %cst_19 = arith.constant dense<0.000000e+00> : vector<128x128xf32>
    %16 = tpu.matmul %13, %15, %cst_19 {dimension_numbers = #tpu.dot_dimension_numbers<[1], [0], [0], [1], [0, 0, 1, 1], [], []>} : vector<128x128xbf16>, vector<128x128xbf16>, vector<128x128xf32> -> vector<128x128xf32>
    %c0_20 = arith.constant 0 : index
    %c1_21 = arith.constant 1 : index
    %c0_22 = arith.constant 0 : index
    %17 = vector.load %arg8[%c0_20, %c1_21, %c0_22] : memref<10x18x128xf32, #tpu.memory_space<vmem>>, vector<8x16x128xf32>
    %18 = vector.shape_cast %17 : vector<8x16x128xf32> to vector<128x128xf32>
    %19 = arith.truncf %18 : vector<128x128xf32> to vector<128x128xbf16>
    %c1_23 = arith.constant 1 : index
    %c0_24 = arith.constant 0 : index
    %c0_25 = arith.constant 0 : index
    %20 = vector.load %arg5[%c1_23, %c0_24, %c0_25] : memref<9x128x128xbf16, #tpu.memory_space<vmem>>, vector<1x128x128xbf16>
    %21 = vector.shape_cast %20 : vector<1x128x128xbf16> to vector<128x128xbf16>
    %cst_26 = arith.constant dense<0.000000e+00> : vector<128x128xf32>
    %22 = tpu.matmul %19, %21, %cst_26 {dimension_numbers = #tpu.dot_dimension_numbers<[1], [0], [0], [1], [0, 0, 1, 1], [], []>} : vector<128x128xbf16>, vector<128x128xbf16>, vector<128x128xf32> -> vector<128x128xf32>
    %23 = arith.addf %16, %22 : vector<128x128xf32>
    %c0_27 = arith.constant 0 : index
    %c2 = arith.constant 2 : index
    %c0_28 = arith.constant 0 : index
    %24 = vector.load %arg8[%c0_27, %c2, %c0_28] : memref<10x18x128xf32, #tpu.memory_space<vmem>>, vector<8x16x128xf32>
    %25 = vector.shape_cast %24 : vector<8x16x128xf32> to vector<128x128xf32>
    %26 = arith.truncf %25 : vector<128x128xf32> to vector<128x128xbf16>
    %c2_29 = arith.constant 2 : index
    %c0_30 = arith.constant 0 : index
    %c0_31 = arith.constant 0 : index
    %27 = vector.load %arg5[%c2_29, %c0_30, %c0_31] : memref<9x128x128xbf16, #tpu.memory_space<vmem>>, vector<1x128x128xbf16>
    %28 = vector.shape_cast %27 : vector<1x128x128xbf16> to vector<128x128xbf16>
    %cst_32 = arith.constant dense<0.000000e+00> : vector<128x128xf32>
    %29 = tpu.matmul %26, %28, %cst_32 {dimension_numbers = #tpu.dot_dimension_numbers<[1], [0], [0], [1], [0, 0, 1, 1], [], []>} : vector<128x128xbf16>, vector<128x128xbf16>, vector<128x128xf32> -> vector<128x128xf32>
    %30 = arith.addf %23, %29 : vector<128x128xf32>
    %c1_33 = arith.constant 1 : index
    %c0_34 = arith.constant 0 : index
    %c0_35 = arith.constant 0 : index
    %31 = vector.load %arg8[%c1_33, %c0_34, %c0_35] : memref<10x18x128xf32, #tpu.memory_space<vmem>>, vector<8x16x128xf32>
    %32 = vector.shape_cast %31 : vector<8x16x128xf32> to vector<128x128xf32>
    %33 = arith.truncf %32 : vector<128x128xf32> to vector<128x128xbf16>
    %c3 = arith.constant 3 : index
    %c0_36 = arith.constant 0 : index
    %c0_37 = arith.constant 0 : index
    %34 = vector.load %arg5[%c3, %c0_36, %c0_37] : memref<9x128x128xbf16, #tpu.memory_space<vmem>>, vector<1x128x128xbf16>
    %35 = vector.shape_cast %34 : vector<1x128x128xbf16> to vector<128x128xbf16>
    %cst_38 = arith.constant dense<0.000000e+00> : vector<128x128xf32>
    %36 = tpu.matmul %33, %35, %cst_38 {dimension_numbers = #tpu.dot_dimension_numbers<[1], [0], [0], [1], [0, 0, 1, 1], [], []>} : vector<128x128xbf16>, vector<128x128xbf16>, vector<128x128xf32> -> vector<128x128xf32>
    %37 = arith.addf %30, %36 : vector<128x128xf32>
    %c1_39 = arith.constant 1 : index
    %c1_40 = arith.constant 1 : index
    %c0_41 = arith.constant 0 : index
    %38 = vector.load %arg8[%c1_39, %c1_40, %c0_41] : memref<10x18x128xf32, #tpu.memory_space<vmem>>, vector<8x16x128xf32>
    %39 = vector.shape_cast %38 : vector<8x16x128xf32> to vector<128x128xf32>
    %40 = arith.truncf %39 : vector<128x128xf32> to vector<128x128xbf16>
    %c4 = arith.constant 4 : index
    %c0_42 = arith.constant 0 : index
    %c0_43 = arith.constant 0 : index
    %41 = vector.load %arg5[%c4, %c0_42, %c0_43] : memref<9x128x128xbf16, #tpu.memory_space<vmem>>, vector<1x128x128xbf16>
    %42 = vector.shape_cast %41 : vector<1x128x128xbf16> to vector<128x128xbf16>
    %cst_44 = arith.constant dense<0.000000e+00> : vector<128x128xf32>
    %43 = tpu.matmul %40, %42, %cst_44 {dimension_numbers = #tpu.dot_dimension_numbers<[1], [0], [0], [1], [0, 0, 1, 1], [], []>} : vector<128x128xbf16>, vector<128x128xbf16>, vector<128x128xf32> -> vector<128x128xf32>
    %44 = arith.addf %37, %43 : vector<128x128xf32>
    %c1_45 = arith.constant 1 : index
    %c2_46 = arith.constant 2 : index
    %c0_47 = arith.constant 0 : index
    %45 = vector.load %arg8[%c1_45, %c2_46, %c0_47] : memref<10x18x128xf32, #tpu.memory_space<vmem>>, vector<8x16x128xf32>
    %46 = vector.shape_cast %45 : vector<8x16x128xf32> to vector<128x128xf32>
    %47 = arith.truncf %46 : vector<128x128xf32> to vector<128x128xbf16>
    %c5 = arith.constant 5 : index
    %c0_48 = arith.constant 0 : index
    %c0_49 = arith.constant 0 : index
    %48 = vector.load %arg5[%c5, %c0_48, %c0_49] : memref<9x128x128xbf16, #tpu.memory_space<vmem>>, vector<1x128x128xbf16>
    %49 = vector.shape_cast %48 : vector<1x128x128xbf16> to vector<128x128xbf16>
    %cst_50 = arith.constant dense<0.000000e+00> : vector<128x128xf32>
    %50 = tpu.matmul %47, %49, %cst_50 {dimension_numbers = #tpu.dot_dimension_numbers<[1], [0], [0], [1], [0, 0, 1, 1], [], []>} : vector<128x128xbf16>, vector<128x128xbf16>, vector<128x128xf32> -> vector<128x128xf32>
    %51 = arith.addf %44, %50 : vector<128x128xf32>
    %c2_51 = arith.constant 2 : index
    %c0_52 = arith.constant 0 : index
    %c0_53 = arith.constant 0 : index
    %52 = vector.load %arg8[%c2_51, %c0_52, %c0_53] : memref<10x18x128xf32, #tpu.memory_space<vmem>>, vector<8x16x128xf32>
    %53 = vector.shape_cast %52 : vector<8x16x128xf32> to vector<128x128xf32>
    %54 = arith.truncf %53 : vector<128x128xf32> to vector<128x128xbf16>
    %c6 = arith.constant 6 : index
    %c0_54 = arith.constant 0 : index
    %c0_55 = arith.constant 0 : index
    %55 = vector.load %arg5[%c6, %c0_54, %c0_55] : memref<9x128x128xbf16, #tpu.memory_space<vmem>>, vector<1x128x128xbf16>
    %56 = vector.shape_cast %55 : vector<1x128x128xbf16> to vector<128x128xbf16>
    %cst_56 = arith.constant dense<0.000000e+00> : vector<128x128xf32>
    %57 = tpu.matmul %54, %56, %cst_56 {dimension_numbers = #tpu.dot_dimension_numbers<[1], [0], [0], [1], [0, 0, 1, 1], [], []>} : vector<128x128xbf16>, vector<128x128xbf16>, vector<128x128xf32> -> vector<128x128xf32>
    %58 = arith.addf %51, %57 : vector<128x128xf32>
    %c2_57 = arith.constant 2 : index
    %c1_58 = arith.constant 1 : index
    %c0_59 = arith.constant 0 : index
    %59 = vector.load %arg8[%c2_57, %c1_58, %c0_59] : memref<10x18x128xf32, #tpu.memory_space<vmem>>, vector<8x16x128xf32>
    %60 = vector.shape_cast %59 : vector<8x16x128xf32> to vector<128x128xf32>
    %61 = arith.truncf %60 : vector<128x128xf32> to vector<128x128xbf16>
    %c7 = arith.constant 7 : index
    %c0_60 = arith.constant 0 : index
    %c0_61 = arith.constant 0 : index
    %62 = vector.load %arg5[%c7, %c0_60, %c0_61] : memref<9x128x128xbf16, #tpu.memory_space<vmem>>, vector<1x128x128xbf16>
    %63 = vector.shape_cast %62 : vector<1x128x128xbf16> to vector<128x128xbf16>
    %cst_62 = arith.constant dense<0.000000e+00> : vector<128x128xf32>
    %64 = tpu.matmul %61, %63, %cst_62 {dimension_numbers = #tpu.dot_dimension_numbers<[1], [0], [0], [1], [0, 0, 1, 1], [], []>} : vector<128x128xbf16>, vector<128x128xbf16>, vector<128x128xf32> -> vector<128x128xf32>
    %65 = arith.addf %58, %64 : vector<128x128xf32>
    %c2_63 = arith.constant 2 : index
    %c2_64 = arith.constant 2 : index
    %c0_65 = arith.constant 0 : index
    %66 = vector.load %arg8[%c2_63, %c2_64, %c0_65] : memref<10x18x128xf32, #tpu.memory_space<vmem>>, vector<8x16x128xf32>
    %67 = vector.shape_cast %66 : vector<8x16x128xf32> to vector<128x128xf32>
    %68 = arith.truncf %67 : vector<128x128xf32> to vector<128x128xbf16>
    %c8 = arith.constant 8 : index
    %c0_66 = arith.constant 0 : index
    %c0_67 = arith.constant 0 : index
    %69 = vector.load %arg5[%c8, %c0_66, %c0_67] : memref<9x128x128xbf16, #tpu.memory_space<vmem>>, vector<1x128x128xbf16>
    %70 = vector.shape_cast %69 : vector<1x128x128xbf16> to vector<128x128xbf16>
    %cst_68 = arith.constant dense<0.000000e+00> : vector<128x128xf32>
    %71 = tpu.matmul %68, %70, %cst_68 {dimension_numbers = #tpu.dot_dimension_numbers<[1], [0], [0], [1], [0, 0, 1, 1], [], []>} : vector<128x128xbf16>, vector<128x128xbf16>, vector<128x128xf32> -> vector<128x128xf32>
    %72 = arith.addf %65, %71 : vector<128x128xf32>
    %c0_69 = arith.constant 0 : index
    %c0_70 = arith.constant 0 : index
    %73 = vector.load %arg6[%c0_69, %c0_70] : memref<1x128xf32, #tpu.memory_space<vmem>>, vector<1x128xf32>
    %74 = vector.broadcast %73 : vector<1x128xf32> to vector<128x128xf32>
    %75 = arith.addf %72, %74 : vector<128x128xf32>
    %c0_71 = arith.constant 0 : index
    %c0_72 = arith.constant 0 : index
    %c0_73 = arith.constant 0 : index
    %76 = vector.load %arg3[%c0_71, %c0_72, %c0_73] : memref<1x128x128xbf16, #tpu.memory_space<vmem>>, vector<1x128x128xbf16>
    %77 = vector.shape_cast %76 : vector<1x128x128xbf16> to vector<128x128xbf16>
    %78 = arith.extf %77 : vector<128x128xbf16> to vector<128x128xf32>
    %79 = arith.addf %75, %78 : vector<128x128xf32>
    %cst_74 = arith.constant 0.000000e+00 : f32
    %80 = vector.broadcast %cst_74 : f32 to vector<128x128xf32>
    %81 = arith.maximumf %79, %80 : vector<128x128xf32>
    %c0_75 = arith.constant 0 : index
    %c0_76 = arith.constant 0 : index
    %c0_77 = arith.constant 0 : index
    %82 = vector.load %arg7[%c0_75, %c0_76, %c0_77] : memref<1x128x128xf32, #tpu.memory_space<vmem>>, vector<1x128x128xf32>
    %83 = vector.shape_cast %82 : vector<1x128x128xf32> to vector<128x128xf32>
    %84 = vector.shape_cast %81 : vector<128x128xf32> to vector<1x128x128xf32>
    tpu.vector_store %arg7[%c0_75, %c0_76, %c0_77], %84 {strides = array<i32>} : memref<1x128x128xf32, #tpu.memory_space<vmem>>, vector<1x128x128xf32>,
    return
  }
  func.func @transform_0(%arg0: i32, %arg1: i32) -> (i32, i32, i32) {
    %c2_i32 = arith.constant 2 : i32
    %0 = arith.muli %arg0, %c2_i32 : i32
    %1 = arith.addi %0, %arg1 : i32
    %c0_i32 = arith.constant 0 : i32
    %c0_i32_0 = arith.constant 0 : i32
    %c0_i32_1 = arith.constant 0 : i32
    return %1, %c0_i32, %c0_i32_0 : i32, i32, i32
  }
  func.func @transform_1(%arg0: i32, %arg1: i32) -> (i32, i32, i32) {
    %c0_i32 = arith.constant 0 : i32
    %c0_i32_0 = arith.constant 0 : i32
    return %arg0, %arg1, %c0_i32 : i32, i32, i32
  }
  func.func @transform_2(%arg0: i32, %arg1: i32) -> (i32, i32) {
    %c0_i32 = arith.constant 0 : i32
    %c0_i32_0 = arith.constant 0 : i32
    %c0_i32_1 = arith.constant 0 : i32
    return %c0_i32, %c0_i32_0 : i32, i32
  }
  func.func @transform_3(%arg0: i32, %arg1: i32) -> (i32, i32, i32) {
    %c0_i32 = arith.constant 0 : i32
    %c0_i32_0 = arith.constant 0 : i32
    %c0_i32_1 = arith.constant 0 : i32
    %c0_i32_2 = arith.constant 0 : i32
    return %c0_i32, %c0_i32_0, %c0_i32_1 : i32, i32, i32
  }
  func.func @transform_4(%arg0: i32, %arg1: i32) -> (i32, i32) {
    %c0_i32 = arith.constant 0 : i32
    %c0_i32_0 = arith.constant 0 : i32
    %c0_i32_1 = arith.constant 0 : i32
    return %c0_i32, %c0_i32_0 : i32, i32
  }
  func.func @transform_5(%arg0: i32, %arg1: i32) -> (i32, i32, i32) {
    %c0_i32 = arith.constant 0 : i32
    %c0_i32_0 = arith.constant 0 : i32
    return %arg0, %arg1, %c0_i32 : i32, i32, i32
  }
}

</mosaic_0001>

<bundles_post_ra>
// kernel: resblock_forward.1
= control target key start
LH: loop header
LB: loop body
LE: loop exit
PB: predicated region body
PF: predicated region fallthrough
CT: control target
= control target key end

     0   :  { %s3700_s18 = smov 0   ;;  %s3702_s19 = smov 0   ;;  %s4185_s0 = inlined_call_operand.vmem [shape: bf16[4,160,128], index: 0, kind: input, shape index: {}]   ;;  %s4186_s1 = inlined_call_operand.vmem [shape: bf16[2,256,128], index: 1, kind: input, shape index: {}]   ;;  %s4187_s2 = inlined_call_operand.vmem [shape: bf16[128,128], index: 2, kind: input, shape index: {}]   ;;  %s4188_s3 = inlined_call_operand.vmem [shape: bf16[9,128,128], index: 3, kind: input, shape index: {}]   ;;  %s4189_s4 = inlined_call_operand.vmem [shape: f32[1,128], index: 4, kind: input, shape index: {}]   ;;  %s4190_s5 = inlined_call_operand.vmem [shape: f32[2,256,128], index: 5, kind: output, shape index: {}]  }
   0x1   :  { %s3704_s20 = smov 0   ;;  %s3706_s21 = smov 0  }
   0x2   :  { %s3708_s22 = smov 0  }
   0x3 LB: > { %s24_s23 = sadd.s32 1, %s3659_s20  ;;  %s27_s24 = sadd.s32 1, %s3663_s21  ;;  %s3667_s22 = sphi %s3708_s22, %s15_s22   ;;  %s3663_s21 = sphi %s3706_s21, %s4194_s21   ;;  %s3659_s20 = sphi %s3704_s20, %s4193_s20   ;;  %s3655_s19 = sphi %s3702_s19, %s4192_s19   ;;  %s3651_s18 = sphi %s3700_s18, %s4191_s18  }
   0x4   : > { %p25_p0 = scmp.ge.s32.totalorder %s24_s23, 2  ;;  %p2614_p1 = scmp.ge.s32.totalorder %s3667_s22, 1 }
   0x5   : > { %p226_p2 = scmp.lt.s32.totalorder %s3667_s22, 5 }
   0x6   : > { %s4196_s23 = smov (%p25_p0, %s24_s23), 0  ;;  %s4198_s24 = smov (!%p25_p0, %s27_s24), %s3663_s21 }
   0x7   : > { %p227_p3 = pnand %p2614_p1, %p226_p2  ;;  %p29_p4 = scmp.ge.s32.totalorder %s4198_s24, 2 }
   0x8   : > { %v3539_v0 = vld [vmem:[%s4187_s2] sm:$0xff] (!%p227_p3)   ;;  %s2615_s27 = sshll.u32 (!%p227_p3), %s3655_s19, 1  ;;  %v3540_v1 = vld [vmem:[%s4187_s2 + $0x8] sm:$0xff] (!%p227_p3)   ;;  %v3541_v2 = vld [vmem:[%s4187_s2 + $0x10] sm:$0xff] (!%p227_p3)   ;;  %v3669_v32 = vmov (!%p227_p3), 0.0   ;;  %p279_p6 = scmp.lt.s32.totalorder (!%p227_p3), %s3655_s19, 1 }
   0x9   : > { %s4200_s24 = smov (%p29_p4, %s4198_s24), 0  ;;  %230 = sbr.rel (%p227_p3) target bundleno = 645 (0x285), region = 40 }
   0xa   : > { %s270_s30 = sadd.s32 (!%p227_p3), %s3651_s18, %s2615_s27  ;;  %3045 = vmatprep.subr.bf16.mxu0 (!%p227_p3), %v3539_v0  ;;  %v3542_v3 = vld [vmem:[%s4187_s2 + $0x18] sm:$0xff] (!%p227_p3)   ;;  %v3543_v5 = vld [vmem:[%s4187_s2 + $0x20] sm:$0xff] (!%p227_p3)   ;;  %v3544_v6 = vld [vmem:[%s4187_s2 + $0x28] sm:$0xff] (!%p227_p3)   ;;  %576 = vst [vmem:[#allocation2] sm:$0x1] (!%p227_p3), %v3669_v32 }
   0xb   : > { %p271_p5 = scmp.lt.s32.totalorder (!%p227_p3), %s270_s30, 3  ;;  %3046 = vmatpush3.bf16.msra.mxu0 (!%p227_p3), %v3539_v0  ;;  %v3545_v7 = vld [vmem:[%s4187_s2 + $0x30] sm:$0xff] (!%p227_p3)   ;;  %v3559_v8 = vld [vmem:[%s4188_s3 + $0x100] sm:$0xff] (!%p227_p3)   ;;  %v3561_v9 = vld [vmem:[%s4188_s3 + $0x108] sm:$0xff] (!%p227_p3)   ;;  %577 = vst [vmem:[#allocation2 + $0x18] sm:$0x1] (!%p227_p3), %v3669_v32 }
   0xc   : > { %3047 = vmatprep.subr.bf16.mxu0 (!%p227_p3), %v3540_v1  ;;  %3209 = vmatprep.subr.bf16.mxu1 (!%p227_p3), %v3559_v8  ;;  %v3546_v10 = vld [vmem:[%s4187_s2 + $0x38] sm:$0xff] (!%p227_p3)   ;;  %v3563_v11 = vld [vmem:[%s4188_s3 + $0x110] sm:$0xff] (!%p227_p3)   ;;  %v3557_v12 = vld [vmem:[%s4188_s3 + $0x40] sm:$0xff] (!%p227_p3)   ;;  %578 = vst [vmem:[#allocation2 + $0x30] sm:$0x1] (!%p227_p3), %v3669_v32 }
   0xd   : > { %3210 = vmatpush3.bf16.msra.mxu1 (!%p227_p3), %v3559_v8  ;;  %v3558_v15 = vld [vmem:[%s4188_s3 + $0x48] sm:$0xff] (!%p227_p3)   ;;  %v3560_v16 = vld [vmem:[%s4188_s3 + $0x50] sm:$0xff] (!%p227_p3)   ;;  %v3562_v19 = vld [vmem:[%s4188_s3 + $0x58] sm:$0xff] (!%p227_p3)   ;;  %579 = vst [vmem:[#allocation2 + $0x48] sm:$0x1] (!%p227_p3), %v3669_v32 }
   0xe   : > { %3211 = vmatprep.subr.bf16.mxu1 (!%p227_p3), %v3561_v9  ;;  %v3564_v25 = vld [vmem:[%s4188_s3 + $0x60] sm:$0xff] (!%p227_p3)   ;;  %v3565_v26 = vld [vmem:[%s4188_s3 + $0x118] sm:$0xff] (!%p227_p3)   ;;  %v3566_v27 = vld [vmem:[%s4188_s3 + $0x68] sm:$0xff] (!%p227_p3)   ;;  %580 = vst [vmem:[#allocation2 + $0x60] sm:$0x1] (!%p227_p3), %v3669_v32 }
   0xf   : > { %3048 = vmatpush3.bf16.msra.mxu0 (!%p227_p3), %v3540_v1  ;;  %v3567_v28 = vld [vmem:[%s4188_s3 + $0x120] sm:$0xff] (!%p227_p3)   ;;  %v3568_v29 = vld [vmem:[%s4188_s3 + $0x70] sm:$0xff] (!%p227_p3)   ;;  %v3569_v30 = vld [vmem:[%s4188_s3 + $0x128] sm:$0xff] (!%p227_p3)   ;;  %581 = vst [vmem:[#allocation2 + $0x78] sm:$0x1] (!%p227_p3), %v3669_v32 }
  0x10   : > { %s4202_s30 = smov (!%p271_p5, %s270_s30), 3  ;;  %3049 = vmatprep.subr.bf16.mxu0 %v3541_v2  ;;  %v3570_v31 = vld [vmem:[%s4188_s3 + $0x78] sm:$0xff]   ;;  %582 = vst [vmem:[#allocation2 + $0x90] sm:$0x1] %v3669_v32  ;;  %583 = vst [vmem:[#allocation2 + $0xa8] sm:$0x1] %v3669_v32 }
  0x11   : > { %s3497_s8 = smul.u32 80, %s4202_s30  ;;  %3212 = vmatpush3.bf16.msra.mxu1 %v3561_v9  ;;  %584 = vst [vmem:[#allocation2 + $0xc0] sm:$0x1] %v3669_v32  ;;  %585 = vst [vmem:[#allocation2 + $0xd8] sm:$0x1] %v3669_v32  ;;  %v3571_v33 = vld [vmem:[%s4188_s3 + $0x130] sm:$0xff]  }
  0x12   : > { %3213 = vmatprep.subr.bf16.mxu1 %v3563_v11  ;;  %586 = vst [vmem:[#allocation2 + $0x11] sm:$0x1] %v3669_v32  ;;  %587 = vst [vmem:[#allocation2 + $0x29] sm:$0x1] %v3669_v32  ;;  %v3572_v34 = vld [vmem:[%s4188_s3] sm:$0xff]   ;;  %v3573_v35 = vld [vmem:[%s4188_s3 + $0x138] sm:$0xff]  }
  0x13   : > { %s3751_s13 = scalar_lea.vmem %s4185_s0, %s3497_s8  ;;  %3050 = vmatpush3.bf16.msra.mxu0 %v3541_v2  ;;  %588 = vst [vmem:[#allocation2 + $0x41] sm:$0x1] %v3669_v32  ;;  %589 = vst [vmem:[#allocation2 + $0x59] sm:$0x1] %v3669_v32  ;;  %v3575_v36 = vld [vmem:[%s4188_s3 + $0x140] sm:$0xff]   ;;  %v3574_v47 = vld [vmem:[%s4188_s3 + $0x8] sm:$0xff]  }
  0x14   : > { %v3547_v4 = vld [vmem:[%s3751_s13] sm:$0xff]   ;;  %3051 = vmatprep.subr.bf16.mxu0 %v3542_v3  ;;  %v3548_v13 = vld [vmem:[%s3751_s13 + $0x8] sm:$0xff]   ;;  %v3549_v14 = vld [vmem:[%s3751_s13 + $0x10] sm:$0xff]   ;;  %590 = vst [vmem:[#allocation2 + $0x71] sm:$0x1] %v3669_v32  ;;  %s2617_s30 = sshll.u32 %s3651_s18, 4 }
  0x15   : > { %3061 = vmatprep.mubr.bf16.mxu0 %v3547_v4  ;;  %3214 = vmatpush3.bf16.msra.mxu1 %v3563_v11  ;;  %v3550_v17 = vld [vmem:[%s3751_s13 + $0x18] sm:$0xff]   ;;  %v3551_v18 = vld [vmem:[%s3751_s13 + $0x20] sm:$0xff]   ;;  %v3552_v20 = vld [vmem:[%s3751_s13 + $0x28] sm:$0xff]   ;;  %591 = vst [vmem:[#allocation2 + $0x89] sm:$0x1] %v3669_v32  ;;  %p281_p7 = scmp.lt.s32.totalorder %s2617_s30, 31 }
  0x16   : > { %v3553_v21 = vld [vmem:[%s3751_s13 + $0x30] sm:$0xff]   ;;  %v3554_v22 = vld [vmem:[%s3751_s13 + $0x38] sm:$0xff]   ;;  %v3555_v23 = vld [vmem:[%s3751_s13 + $0x40] sm:$0xff]   ;;  %3215 = vmatprep.subr.bf16.mxu1 %v3565_v26  ;;  %592 = vst [vmem:[#allocation2 + $0xa1] sm:$0x1] %v3669_v32  ;;  %s4204_s19 = smov (!%p279_p6, %s3655_s19), 1 }
  0x17   : > { %3052 = vmatpush3.bf16.msra.mxu0 %v3542_v3  ;;  %v3556_v24 = vld [vmem:[%s3751_s13 + $0x48] sm:$0xff]   ;;  %593 = vst [vmem:[#allocation2 + $0xb9] sm:$0x1] %v3669_v32  ;;  %594 = vst [vmem:[#allocation2 + $0xd1] sm:$0x1] %v3669_v32  ;;  %v3576_v55 = vld [vmem:[%s4188_s3 + $0x10] sm:$0xff]  }
  0x18   : > { %3053 = vmatprep.subr.bf16.mxu0 %v3543_v5  ;;  %595 = vst [vmem:[#allocation2 + $0xe9] sm:$0x1] %v3669_v32  ;;  %v3577_v59 = vld [vmem:[%s4188_s3 + $0x148] sm:$0xff]   ;;  %v3578_v60 = vld [vmem:[%s4188_s3 + $0x18] sm:$0xff]   ;;  %v3579_v2 = vld [vmem:[%s4188_s3 + $0x150] sm:$0xff]   ;;  %s4206_s30 = smov (!%p281_p7, %s2617_s30), 31 }
  0x19   : > { %3216 = vmatpush3.bf16.msra.mxu1 %v3565_v26  ;;  %v3581_v9 = vld [vmem:[%s4188_s3 + $0x158] sm:$0xff]   ;;  %s2618_s6 = sshll.u32 %s4204_s19, 5 }
  0x1a   : > { %3217 = vmatprep.subr.bf16.mxu1 %v3567_v28  ;;  %s284_s18 = sadd.s32 %s2618_s6, %s4206_s30 }
  0x1b   : > { %3054 = vmatpush3.bf16.msra.mxu0 %v3543_v5  ;;  %v3580_v5 = vld [vmem:[%s4188_s3 + $0x20] sm:$0xff]   ;;  %s2619_s13 = sshll.u32 %s284_s18, 2  ;;  %s2622_s11 = sshll.u32 %s284_s18, 3 }
  0x1c   : > { %3055 = vmatprep.subr.bf16.mxu0 %v3544_v6  ;;  %s4109_s9 = scalar_lea.vmem %s4186_s1, %s2619_s13  ;;  %s4124_s15 = scalar_lea.vmem %s4190_s5, %s2622_s11 }
  0x1d   : > { %3218 = vmatpush3.bf16.msra.mxu1 %v3567_v28 }
  0x1e   : > { %3219 = vmatprep.subr.bf16.mxu1 %v3569_v30 }
  0x1f   : > { %3056 = vmatpush3.bf16.msra.mxu0 %v3544_v6 }
  0x20   : > { %3057 = vmatprep.subr.bf16.mxu0 %v3545_v7 }
  0x21   : > { %3220 = vmatpush3.bf16.msra.mxu1 %v3569_v30 }
  0x22   : > { %3221 = vmatprep.subr.bf16.mxu1 %v3571_v33 }
  0x23   : > { %3058 = vmatpush3.bf16.msra.mxu0 %v3545_v7 }
  0x24   : > { %3059 = vmatprep.subr.bf16.mxu0 %v3546_v10 }
  0x25   : > { %3222 = vmatpush3.bf16.msra.mxu1 %v3571_v33  ;;  %v3587_v33 = vld [vmem:[%s4188_s3 + $0x170] sm:$0xff]  }
  0x26   : > { %3223 = vmatprep.subr.bf16.mxu1 %v3573_v35 }
  0x27   : > { %3060 = vmatpush3.bf16.msra.mxu0 %v3546_v10  ;;  %v3582_v10 = vld [vmem:[%s4188_s3 + $0x28] sm:$0xff]  }
  0x28   : > { %3081 = vmatprep.subr.bf16.mxu0 %v3557_v12 }
  0x29   : > { %3224 = vmatpush3.bf16.msra.mxu1 %v3573_v35 }
  0x2a   : > { %3062 = vmatmul.mubr.bf16.vlgmr.msra.gmra.mrb[0].mxu0 %v3548_v13  ;;  %3241 = vmatprep.subr.bf16.mxu1 %v3575_v36 }
  0x2b   : > { %3065 = vmatprep.mubr.bf16.mxu0 %v3549_v14  ;;  %3082 = vmatpush3.bf16.msra.mxu0 %v3557_v12 }
  0x2c   : > { %3083 = vmatprep.subr.bf16.mxu0 %v3558_v15 }
  0x2f   : > { %3084 = vmatpush3.bf16.msra.mxu0 %v3558_v15 }
  0x30   : > { %3085 = vmatprep.subr.bf16.mxu0 %v3560_v16 }
  0x32   : > { %3066 = vmatmul.mubr.bf16.gmra.mrb[4].mxu0 %v3550_v17 }
  0x33   : > { %3069 = vmatprep.mubr.bf16.mxu0 %v3551_v18  ;;  %3086 = vmatpush3.bf16.msra.mxu0 %v3560_v16  ;;  %v3583_v16 = vld [vmem:[%s4188_s3 + $0x160] sm:$0xff]  }
  0x34   : > { %3087 = vmatprep.subr.bf16.mxu0 %v3562_v19 }
  0x37   : > { %3088 = vmatpush3.bf16.msra.mxu0 %v3562_v19  ;;  %v3584_v19 = vld [vmem:[%s4188_s3 + $0x30] sm:$0xff]  }
  0x38   : > { %3089 = vmatprep.subr.bf16.mxu0 %v3564_v25 }
  0x3a   : > { %3070 = vmatmul.mubr.bf16.gmra.mrb[8].mxu0 %v3552_v20 }
  0x3b   : > { %3073 = vmatprep.mubr.bf16.mxu0 %v3553_v21  ;;  %3090 = vmatpush3.bf16.msra.mxu0 %v3564_v25 }
  0x3c   : > { %3091 = vmatprep.subr.bf16.mxu0 %v3566_v27 }
  0x3f   : > { %3092 = vmatpush3.bf16.msra.mxu0 %v3566_v27  ;;  %v3586_v27 = vld [vmem:[%s4188_s3 + $0x38] sm:$0xff]  }
  0x40   : > { %3093 = vmatprep.subr.bf16.mxu0 %v3568_v29 }
  0x42   : > { %3074 = vmatmul.mubr.bf16.gmra.mrb[12].mxu0 %v3554_v22 }
  0x43   : > { %3077 = vmatprep.mubr.bf16.mxu0 %v3555_v23  ;;  %3094 = vmatpush3.bf16.msra.mxu0 %v3568_v29 }
  0x44   : > { %3095 = vmatprep.subr.bf16.mxu0 %v3570_v31 }
  0x47   : > { %3096 = vmatpush3.bf16.msra.mxu0 %v3570_v31 }
  0x48   : > { %3113 = vmatprep.subr.bf16.mxu0 %v3572_v34 }
  0x4a   : > { %3078 = vmatmul.mubr.bf16.gmra.mrb[16].mxu0 %v3556_v24  ;;  %v3585_v24 = vld [vmem:[%s4188_s3 + $0x168] sm:$0xff]  }
  0xfd   : > { %v3063_v37 = vpop.f32.mrb[0].mxu0 }
  0xfe   : > { %v558_v38 = vmax.f32 %v3063_v37, 0.0  ;;  %v477_v39 = vpop.f32.mrb[1].mxu0 }
  0xff   : > { %v556_v40 = vmax.f32 %v477_v39, 0.0  ;;  %v3064_v41 = vpop.f32.mrb[2].mxu0 }
 0x100   : > { %598 = vst [vmem:[#allocation2 + $0x19] sm:$0xff] %v558_v38  ;;  %v559_v42 = vmax.f32 %v3064_v41, 0.0  ;;  %v480_v43 = vpop.f32.mrb[3].mxu0 }
 0x101   : > { %596 = vst [vmem:[#allocation2 + $0x1] sm:$0xff] %v556_v40  ;;  %v557_v44 = vmax.f32 %v480_v43, 0.0 }
 0x102   : > { %599 = vst [vmem:[#allocation2 + $0x21] sm:$0xff] %v559_v42  ;;  %v1408_v45 = vpack.c.bf16 %v559_v42, %v558_v38 }
 0x103   : > { %597 = vst [vmem:[#allocation2 + $0x9] sm:$0xff] %v557_v44  ;;  %v672_v46 = vpack.c.bf16 %v557_v44, %v556_v40 }
 0x104   : > { %3225 = vmatprep.mubr.bf16.mxu1 %v1408_v45 }
 0x105   : > { %v3067_v48 = vpop.f32.mrb[4].mxu0  ;;  %3097 = vmatprep.mubr.bf16.mxu0 %v672_v46 }
 0x106   : > { %v562_v49 = vmax.f32 %v3067_v48, 0.0  ;;  %v493_v50 = vpop.f32.mrb[5].mxu0  ;;  %3098 = vmatmul.mubr.bf16.vlgmr.msra.gmra.mrb[20].mxu0 %v1408_v45 }
 0x107   : > { %v560_v51 = vmax.f32 %v493_v50, 0.0  ;;  %v3068_v52 = vpop.f32.mrb[6].mxu0  ;;  %3114 = vmatpush3.bf16.msra.mxu0 %v3572_v34  ;;  %v618_v44 = vld [vmem:[#allocation2 + $0x18] sm:$0xff]  ;;  %v3590_v50 = vld [vmem:[%s4188_s3 + $0x88] sm:$0xff]  }
 0x108   : > { %602 = vst [vmem:[#allocation2 + $0x49] sm:$0xff] %v562_v49  ;;  %v563_v53 = vmax.f32 %v3068_v52, 0.0  ;;  %v496_v54 = vpop.f32.mrb[7].mxu0  ;;  %3115 = vmatprep.subr.bf16.mxu0 %v3574_v47  ;;  %v616_v26 = vld [vmem:[#allocation2] sm:$0xff] }
 0x109   : > { %600 = vst [vmem:[#allocation2 + $0x31] sm:$0xff] %v560_v51  ;;  %v561_v56 = vmax.f32 %v496_v54, 0.0  ;;  %v619_v38 = vld [vmem:[#allocation2 + $0x20] sm:$0xff] }
 0x10a   : > { %603 = vst [vmem:[#allocation2 + $0x51] sm:$0xff] %v563_v53  ;;  %v675_v57 = vpack.c.bf16 %v563_v53, %v562_v49  ;;  %v617_v23 = vld [vmem:[#allocation2 + $0x8] sm:$0xff]  ;;  %v1594_v39 = vld [vmem:[#allocation2 + $0x1a] sm:$0xff]  ;;  %v3887_v45 = vpack.c.bf16 %v619_v38, %v618_v44  ;;  %v3603_v38 = vld [vmem:[%s4188_s3 + $0x1b0] sm:$0xff]  }
 0x10b   : > { %601 = vst [vmem:[#allocation2 + $0x39] sm:$0xff] %v561_v56  ;;  %3116 = vmatpush3.bf16.msra.mxu0 %v3574_v47  ;;  %v674_v58 = vpack.c.bf16 %v561_v56, %v560_v51  ;;  %v632_v30 = vpack.c.bf16 %v617_v23, %v616_v26  ;;  %v1595_v40 = vld [vmem:[#allocation2 + $0x22] sm:$0xff]  ;;  %v3589_v47 = vld [vmem:[%s4188_s3 + $0x178] sm:$0xff]   ;;  %v3600_v26 = vld [vmem:[%s4188_s3 + $0xb0] sm:$0xff]  }
 0x10c   : > { %3117 = vmatprep.subr.bf16.mxu0 %v3576_v55  ;;  %v3893_v48 = vpack.c.bf16 %v1595_v40, %v1594_v39  ;;  %v3591_v51 = vld [vmem:[%s4188_s3 + $0x180] sm:$0xff]  }
 0x10d   : > { %v3071_v61 = vpop.f32.mrb[8].mxu0  ;;  %3101 = vmatprep.mubr.bf16.mxu0 %v674_v58  ;;  %3226 = vmatmul.mubr.bf16.vlgmr.msra.gmra.mrb[0].mxu1 %v674_v58 }
 0x10e   : > { %v566_v62 = vmax.f32 %v3071_v61, 0.0  ;;  %v509_v63 = vpop.f32.mrb[9].mxu0  ;;  %3242 = vmatpush3.bf16.msra.mxu1 %v3575_v36  ;;  %3102 = vmatmul.mubr.bf16.gmra.mrb[24].mxu0 %v675_v57  ;;  %v3588_v36 = vld [vmem:[%s4188_s3 + $0x80] sm:$0xff]  }
 0x10f   : > { %v564_v0 = vmax.f32 %v509_v63, 0.0  ;;  %v3072_v1 = vpop.f32.mrb[10].mxu0  ;;  %3229 = vmatprep.mubr.bf16.mxu1 %v675_v57  ;;  %3118 = vmatpush3.bf16.msra.mxu0 %v3576_v55  ;;  %v3592_v55 = vld [vmem:[%s4188_s3 + $0x90] sm:$0xff]   ;;  %v3593_v63 = vld [vmem:[%s4188_s3 + $0x188] sm:$0xff]  }
 0x110   : > { %606 = vst [vmem:[#allocation2 + $0x79] sm:$0xff] %v566_v62  ;;  %v567_v3 = vmax.f32 %v3072_v1, 0.0  ;;  %v512_v4 = vpop.f32.mrb[11].mxu0  ;;  %3243 = vmatprep.subr.bf16.mxu1 %v3577_v59  ;;  %3119 = vmatprep.subr.bf16.mxu0 %v3578_v60  ;;  %v620_v46 = vld [vmem:[#allocation2 + $0x30] sm:$0xff] }
 0x111   : > { %604 = vst [vmem:[#allocation2 + $0x61] sm:$0xff] %v564_v0  ;;  %v565_v6 = vmax.f32 %v512_v4, 0.0  ;;  %v623_v54 = vld [vmem:[#allocation2 + $0x50] sm:$0xff] }
 0x112   : > { %607 = vst [vmem:[#allocation2 + $0x81] sm:$0xff] %v567_v3  ;;  %3244 = vmatpush3.bf16.msra.mxu1 %v3577_v59  ;;  %v677_v7 = vpack.c.bf16 %v567_v3, %v566_v62  ;;  %v621_v41 = vld [vmem:[#allocation2 + $0x38] sm:$0xff]  ;;  %v1598_v56 = vld [vmem:[#allocation2 + $0x4a] sm:$0xff] }
 0x113   : > { %605 = vst [vmem:[#allocation2 + $0x69] sm:$0xff] %v565_v6  ;;  %3120 = vmatpush3.bf16.msra.mxu0 %v3578_v60  ;;  %3245 = vmatprep.subr.bf16.mxu1 %v3579_v2  ;;  %v3847_v8 = vpack.c.bf16 %v565_v6, %v564_v0  ;;  %v3895_v49 = vpack.c.bf16 %v621_v41, %v620_v46  ;;  %v1596_v52 = vld [vmem:[#allocation2 + $0x32] sm:$0xff]  ;;  %v1597_v53 = vld [vmem:[#allocation2 + $0x3a] sm:$0xff]  ;;  %v622_v60 = vld [vmem:[#allocation2 + $0x48] sm:$0xff] }
 0x114   : > { %3121 = vmatprep.subr.bf16.mxu0 %v3580_v5  ;;  %v1599_v57 = vld [vmem:[#allocation2 + $0x52] sm:$0xff]  ;;  %v3909_v59 = vpack.c.bf16 %v1597_v53, %v1596_v52  ;;  %v3911_v61 = vpack.c.bf16 %v623_v54, %v622_v60  ;;  %v3604_v41 = vld [vmem:[%s4188_s3 + $0xc0] sm:$0xff]   ;;  %v3609_v52 = vld [vmem:[%s4188_s3 + $0x1c8] sm:$0xff]  }
 0x115   : > { %v3075_v11 = vpop.f32.mrb[12].mxu0  ;;  %3105 = vmatprep.mubr.bf16.mxu0 %v3847_v8  ;;  %3230 = vmatmul.mubr.bf16.gmra.mrb[4].mxu1 %v3847_v8  ;;  %v3917_v0 = vpack.c.bf16 %v1599_v57, %v1598_v56  ;;  %v3595_v3 = vld [vmem:[%s4188_s3 + $0x190] sm:$0xff]   ;;  %v3605_v46 = vld [vmem:[%s4188_s3 + $0x1b8] sm:$0xff]   ;;  %v3612_v54 = vld [vmem:[%s4188_s3 + $0xe0] sm:$0xff]  }
 0x116   : > { %v570_v12 = vmax.f32 %v3075_v11, 0.0  ;;  %v525_v13 = vpop.f32.mrb[13].mxu0  ;;  %3246 = vmatpush3.bf16.msra.mxu1 %v3579_v2  ;;  %3106 = vmatmul.mubr.bf16.gmra.mrb[28].mxu0 %v677_v7  ;;  %v3594_v2 = vld [vmem:[%s4188_s3 + $0x98] sm:$0xff]   ;;  %v3611_v53 = vld [vmem:[%s4188_s3 + $0x1d0] sm:$0xff]   ;;  %v3614_v56 = vld [vmem:[%s4188_s3 + $0xe8] sm:$0xff]  }
 0x117   : > { %v568_v14 = vmax.f32 %v525_v13, 0.0  ;;  %v3076_v15 = vpop.f32.mrb[14].mxu0  ;;  %3233 = vmatprep.mubr.bf16.mxu1 %v677_v7  ;;  %3122 = vmatpush3.bf16.msra.mxu0 %v3580_v5  ;;  %v3596_v7 = vld [vmem:[%s4188_s3 + $0xa0] sm:$0xff]   ;;  %v626_v13 = vld [vmem:[#allocation2 + $0x78] sm:$0xff] }
 0x118   : > { %610 = vst [vmem:[#allocation2 + $0xa9] sm:$0xff] %v570_v12  ;;  %v3860_v17 = vmax.f32 %v3076_v15, 0.0  ;;  %v528_v18 = vpop.f32.mrb[15].mxu0  ;;  %3247 = vmatprep.subr.bf16.mxu1 %v3581_v9  ;;  %3123 = vmatprep.subr.bf16.mxu0 %v3582_v10  ;;  %v624_v62 = vld [vmem:[#allocation2 + $0x60] sm:$0xff] }
 0x119   : > { %608 = vst [vmem:[#allocation2 + $0x91] sm:$0xff] %v568_v14  ;;  %v569_v20 = vmax.f32 %v528_v18, 0.0  ;;  %v627_v6 = vld [vmem:[#allocation2 + $0x80] sm:$0xff] }
 0x11a   : > { %611 = vst [vmem:[#allocation2 + $0xb1] sm:$0xff] %v3860_v17  ;;  %3248 = vmatpush3.bf16.msra.mxu1 %v3581_v9  ;;  %v679_v21 = vpack.c.bf16 %v3860_v17, %v570_v12  ;;  %v625_v58 = vld [vmem:[#allocation2 + $0x68] sm:$0xff]  ;;  %v1602_v9 = vld [vmem:[#allocation2 + $0x7a] sm:$0xff] }
 0x11b   : > { %609 = vst [vmem:[#allocation2 + $0x99] sm:$0xff] %v569_v20  ;;  %3124 = vmatpush3.bf16.msra.mxu0 %v3582_v10  ;;  %3249 = vmatprep.subr.bf16.mxu1 %v3583_v16  ;;  %v3867_v22 = vpack.c.bf16 %v569_v20, %v568_v14  ;;  %v3919_v1 = vpack.c.bf16 %v625_v58, %v624_v62  ;;  %v1600_v4 = vld [vmem:[#allocation2 + $0x62] sm:$0xff]  ;;  %v1601_v5 = vld [vmem:[#allocation2 + $0x6a] sm:$0xff] }
 0x11c   : > { %3125 = vmatprep.subr.bf16.mxu0 %v3584_v19  ;;  %v1603_v10 = vld [vmem:[#allocation2 + $0x82] sm:$0xff]  ;;  %v3933_v12 = vpack.c.bf16 %v1601_v5, %v1600_v4  ;;  %v3935_v14 = vpack.c.bf16 %v627_v6, %v626_v13  ;;  %v3616_v58 = vld [vmem:[%s4188_s3 + $0xf0] sm:$0xff]   ;;  %v2000_v6 = vld [vmem:[#allocation2 + $0x39] sm:$0xff] }
 0x11d   : > { %v3079_v25 = vpop.f32.mrb[16].mxu0  ;;  %3109 = vmatprep.mubr.bf16.mxu0 %v3867_v22  ;;  %3234 = vmatmul.mubr.bf16.gmra.mrb[8].mxu1 %v3867_v22  ;;  %v3941_v18 = vpack.c.bf16 %v1603_v10, %v1602_v9  ;;  %v3598_v20 = vld [vmem:[%s4188_s3 + $0xa8] sm:$0xff]   ;;  %v3615_v57 = vld [vmem:[%s4188_s3 + $0x1e0] sm:$0xff]   ;;  %v3619_v4 = vld [vmem:[%s4188_s3 + $0x1f0] sm:$0xff]  }
 0x11e   : > { %v574_v28 = vmax.f32 %v3079_v25, 0.0  ;;  %v541_v29 = vpop.f32.mrb[17].mxu0  ;;  %3250 = vmatpush3.bf16.msra.mxu1 %v3583_v16  ;;  %3110 = vmatmul.mubr.bf16.gmra.mrb[32].mxu0 %v679_v21  ;;  %v3597_v16 = vld [vmem:[%s4188_s3 + $0x198] sm:$0xff]  }
 0x11f   : > { %v572_v31 = vmax.f32 %v541_v29, 0.0  ;;  %v3080_v32 = vpop.f32.mrb[18].mxu0  ;;  %3237 = vmatprep.mubr.bf16.mxu1 %v679_v21  ;;  %3126 = vmatpush3.bf16.msra.mxu0 %v3584_v19  ;;  %v3599_v21 = vld [vmem:[%s4188_s3 + $0x1a0] sm:$0xff]   ;;  %v1999_v10 = vld [vmem:[#allocation2 + $0x31] sm:$0xff] }
 0x120   : > { %614 = vst [vmem:[#allocation2 + $0xd9] sm:$0xff] %v574_v28  ;;  %v575_v34 = vmax.f32 %v3080_v32, 0.0  ;;  %v544_v35 = vpop.f32.mrb[19].mxu0  ;;  %3129 = vmatprep.mubr.bf16.mxu0 %v632_v30  ;;  %3251 = vmatprep.subr.bf16.mxu1 %v3585_v24  ;;  %v628_v15 = vld [vmem:[#allocation2 + $0x90] sm:$0xff]  ;;  %v630_v32 = vld [vmem:[#allocation2 + $0xa8] sm:$0xff]  ;;  %v2015_v13 = vpack.c.bf16 %v2000_v6, %v1999_v10 }
 0x121   : > { %612 = vst [vmem:[#allocation2 + $0xc1] sm:$0xff] %v572_v31  ;;  %v573_v37 = vmax.f32 %v544_v35, 0.0  ;;  %3127 = vmatprep.subr.bf16.mxu0 %v3586_v27  ;;  %v631_v25 = vld [vmem:[#allocation2 + $0xb0] sm:$0xff] }
 0x122   : > { %615 = vst [vmem:[#allocation2 + $0xe1] sm:$0xff] %v575_v34  ;;  %3252 = vmatpush3.bf16.msra.mxu1 %v3585_v24  ;;  %v3883_v42 = vpack.c.bf16 %v575_v34, %v574_v28  ;;  %v629_v11 = vld [vmem:[#allocation2 + $0x98] sm:$0xff]  ;;  %v1606_v28 = vld [vmem:[#allocation2 + $0xaa] sm:$0xff] }
 0x123   : > { %613 = vst [vmem:[#allocation2 + $0xc9] sm:$0xff] %v573_v37  ;;  %3128 = vmatpush3.bf16.msra.mxu0 %v3586_v27  ;;  %3253 = vmatprep.subr.bf16.mxu1 %v3587_v33  ;;  %v3885_v43 = vpack.c.bf16 %v573_v37, %v572_v31  ;;  %v3943_v19 = vpack.c.bf16 %v629_v11, %v628_v15  ;;  %v1604_v23 = vld [vmem:[#allocation2 + $0x92] sm:$0xff]  ;;  %v1605_v24 = vld [vmem:[#allocation2 + $0x9a] sm:$0xff]  ;;  %v987_v27 = vld [vmem:[#allocation2 + $0x2] sm:$0xff] }
 0x124   : > { %3145 = vmatprep.subr.bf16.mxu0 %v3588_v36  ;;  %v1607_v29 = vld [vmem:[#allocation2 + $0xb2] sm:$0xff]  ;;  %v988_v30 = vld [vmem:[#allocation2 + $0xa] sm:$0xff]  ;;  %v3957_v31 = vpack.c.bf16 %v1605_v24, %v1604_v23 }
 0x125   : > { %3238 = vmatmul.mubr.bf16.gmra.mrb[12].mxu1 %v3885_v43  ;;  %v3601_v34 = vld [vmem:[%s4188_s3 + $0x1a8] sm:$0xff]   ;;  %v3965_v35 = vpack.c.bf16 %v1607_v29, %v1606_v28  ;;  %v3602_v37 = vld [vmem:[%s4188_s3 + $0xb8] sm:$0xff]  }
 0x126   : > { %3254 = vmatpush3.bf16.msra.mxu1 %v3587_v33  ;;  %3130 = vmatmul.mubr.bf16.vlgmr.msra.gmra.mrb[20].mxu0 %v3887_v45  ;;  %v3959_v33 = vpack.c.bf16 %v631_v25, %v630_v32  ;;  %v3620_v11 = vld [vmem:[%s4188_s3 + $0x1f8] sm:$0xff]  }
 0x127   : > { %3257 = vmatprep.mubr.bf16.mxu1 %v3893_v48  ;;  %3133 = vmatprep.mubr.bf16.mxu0 %v3895_v49  ;;  %v2002_v15 = vld [vmem:[#allocation2 + $0x51] sm:$0xff]  ;;  %v2005_v23 = vld [vmem:[#allocation2 + $0x79] sm:$0xff] }
 0x128   : > { %3146 = vmatpush3.bf16.msra.mxu0 %v3588_v36  ;;  %3255 = vmatprep.subr.bf16.mxu1 %v3589_v47  ;;  %v1003_v36 = vpack.c.bf16 %v988_v30, %v987_v27  ;;  %v1809_v62 = vld [vmem:[#allocation2 + $0xc0] sm:$0xff]  ;;  %v3624_v25 = vld [vmem:[%s4188_s3 + $0x218] sm:$0xff]  }
 0x129   : > { %3147 = vmatprep.subr.bf16.mxu0 %v3590_v50  ;;  %v1812_v5 = vld [vmem:[#allocation2 + $0xe0] sm:$0xff] }
 0x12a   : > { %3256 = vmatpush3.bf16.msra.mxu1 %v3589_v47  ;;  %v1608_v39 = vld [vmem:[#allocation2 + $0xc2] sm:$0xff]  ;;  %v1609_v40 = vld [vmem:[#allocation2 + $0xca] sm:$0xff] }
 0x12b   : > { %3273 = vmatprep.subr.bf16.mxu1 %v3591_v51  ;;  %v3978_v44 = vpack.c.bf16 %v1609_v40, %v1608_v39  ;;  %v3606_v47 = vld [vmem:[%s4188_s3 + $0xc8] sm:$0xff]   ;;  %v2845_v40 = vld [vmem:[%s4109_s9] sm:$0xff]  }
 0x12c   : > { %3148 = vmatpush3.bf16.msra.mxu0 %v3590_v50  ;;  %v3607_v50 = vld [vmem:[%s4188_s3 + $0x1c0] sm:$0xff]   ;;  %v1810_v60 = vld [vmem:[#allocation2 + $0xc8] sm:$0xff] }
 0x12d   : > { %3258 = vmatmul.mubr.bf16.vlgmr.msra.gmra.mrb[0].mxu1 %v3909_v59  ;;  %3149 = vmatprep.subr.bf16.mxu0 %v3592_v55  ;;  %v2876_v39 = vld [vmem:[%s4109_s9 + $0x8] sm:$0xff]  }
 0x12e   : > { %3274 = vmatpush3.bf16.msra.mxu1 %v3591_v51  ;;  %3134 = vmatmul.mubr.bf16.gmra.mrb[24].mxu0 %v3911_v61  ;;  %v3608_v51 = vld [vmem:[%s4188_s3 + $0xd0] sm:$0xff]  }
 0x12f   : > { %3261 = vmatprep.mubr.bf16.mxu1 %v3917_v0  ;;  %3137 = vmatprep.mubr.bf16.mxu0 %v3919_v1 }
 0x130   : > { %3150 = vmatpush3.bf16.msra.mxu0 %v3592_v55  ;;  %3275 = vmatprep.subr.bf16.mxu1 %v3593_v63  ;;  %v3613_v55 = vld [vmem:[%s4188_s3 + $0x1d8] sm:$0xff]  }
 0x131   : > { %3151 = vmatprep.subr.bf16.mxu0 %v3594_v2 }
 0x132   : > { %3276 = vmatpush3.bf16.msra.mxu1 %v3593_v63  ;;  %v3617_v63 = vld [vmem:[%s4188_s3 + $0x1e8] sm:$0xff]  }
 0x133   : > { %3277 = vmatprep.subr.bf16.mxu1 %v3595_v3 }
 0x134   : > { %3152 = vmatpush3.bf16.msra.mxu0 %v3594_v2  ;;  %v1819_v2 = vpack.c.bf16 %v1810_v60, %v1809_v62  ;;  %v2847_v60 = vunpack.c.h.bf16 %v2845_v40 }
 0x135   : > { %3262 = vmatmul.mubr.bf16.gmra.mrb[4].mxu1 %v3933_v12  ;;  %3153 = vmatprep.subr.bf16.mxu0 %v3596_v7 }
 0x136   : > { %3278 = vmatpush3.bf16.msra.mxu1 %v3595_v3  ;;  %3138 = vmatmul.mubr.bf16.gmra.mrb[28].mxu0 %v3935_v14  ;;  %v3618_v3 = vld [vmem:[%s4188_s3 + $0xf8] sm:$0xff]  }
 0x137   : > { %3265 = vmatprep.mubr.bf16.mxu1 %v3941_v18  ;;  %3141 = vmatprep.mubr.bf16.mxu0 %v3943_v19 }
 0x138   : > { %3154 = vmatpush3.bf16.msra.mxu0 %v3596_v7  ;;  %3279 = vmatprep.subr.bf16.mxu1 %v3597_v16  ;;  %v1811_v7 = vld [vmem:[#allocation2 + $0xd8] sm:$0xff] }
 0x139   : > { %3155 = vmatprep.subr.bf16.mxu0 %v3598_v20  ;;  %v1820_v9 = vpack.c.bf16 %v1812_v5, %v1811_v7  ;;  %v2877_v7 = vld [vmem:[%s4109_s9 + $0x10] sm:$0xff]  }
 0x13a   : > { %3280 = vmatpush3.bf16.msra.mxu1 %v3597_v16  ;;  %v2001_v16 = vld [vmem:[#allocation2 + $0x49] sm:$0xff] }
 0x13b   : > { %3281 = vmatprep.subr.bf16.mxu1 %v3599_v21 }
 0x13c   : > { %3156 = vmatpush3.bf16.msra.mxu0 %v3598_v20  ;;  %v2016_v20 = vpack.c.bf16 %v2002_v15, %v2001_v16 }
 0x13d   : > { %3266 = vmatmul.mubr.bf16.gmra.mrb[8].mxu1 %v3957_v31  ;;  %3157 = vmatprep.subr.bf16.mxu0 %v3600_v26 }
 0x13e   : > { %3282 = vmatpush3.bf16.msra.mxu1 %v3599_v21  ;;  %3142 = vmatmul.mubr.bf16.gmra.mrb[32].mxu0 %v3959_v33  ;;  %v3622_v21 = vld [vmem:[%s4188_s3 + $0x208] sm:$0xff]  }
 0x13f   : > { %3269 = vmatprep.mubr.bf16.mxu1 %v3965_v35  ;;  %3161 = vmatprep.mubr.bf16.mxu0 %v1003_v36 }
 0x140   : > { %3158 = vmatpush3.bf16.msra.mxu0 %v3600_v26  ;;  %3283 = vmatprep.subr.bf16.mxu1 %v3601_v34  ;;  %v3626_v26 = vld [vmem:[%s4188_s3 + $0x228] sm:$0xff]  }
 0x141   : > { %3159 = vmatprep.subr.bf16.mxu0 %v3602_v37 }
 0x142   : > { %3284 = vmatpush3.bf16.msra.mxu1 %v3601_v34 }
 0x143   : > { %3285 = vmatprep.subr.bf16.mxu1 %v3603_v38 }
 0x144   : > { %3160 = vmatpush3.bf16.msra.mxu0 %v3602_v37 }
 0x145   : > { %3270 = vmatmul.mubr.bf16.gmra.mrb[12].mxu1 %v3978_v44  ;;  %3177 = vmatprep.subr.bf16.mxu0 %v3604_v41 }
 0x146   : > { %3286 = vmatpush3.bf16.msra.mxu1 %v3603_v38  ;;  %3289 = vmatprep.mubr.bf16.mxu1 %v3895_v49 }
 0x147   : > { %3162 = vmatmul.mubr.bf16.vlgmr.msra.gmra.mrb[20].mxu0 %v3893_v48  ;;  %3287 = vmatprep.subr.bf16.mxu1 %v3605_v46  ;;  %v3610_v48 = vld [vmem:[%s4188_s3 + $0xd8] sm:$0xff]  }
 0x148   : > { %3165 = vmatprep.mubr.bf16.mxu0 %v3909_v59  ;;  %3178 = vmatpush3.bf16.msra.mxu0 %v3604_v41 }
 0x149   : > { %3179 = vmatprep.subr.bf16.mxu0 %v3606_v47 }
 0x14a   : > { %3288 = vmatpush3.bf16.msra.mxu1 %v3605_v46 }
 0x14b   : > { %3305 = vmatprep.subr.bf16.mxu1 %v3607_v50 }
 0x14c   : > { %3180 = vmatpush3.bf16.msra.mxu0 %v3606_v47  ;;  %v2850_v47 = vunpack.c.l.bf16 %v2876_v39 }
 0x14d   : > { %3290 = vmatmul.mubr.bf16.vlgmr.msra.gmra.mrb[0].mxu1 %v3911_v61  ;;  %3181 = vmatprep.subr.bf16.mxu0 %v3608_v51 }
 0x14e   : > { %3306 = vmatpush3.bf16.msra.mxu1 %v3607_v50  ;;  %3293 = vmatprep.mubr.bf16.mxu1 %v3919_v1 }
 0x14f   : > { %3166 = vmatmul.mubr.bf16.gmra.mrb[24].mxu0 %v3917_v0  ;;  %3307 = vmatprep.subr.bf16.mxu1 %v3609_v52 }
 0x150   : > { %3169 = vmatprep.mubr.bf16.mxu0 %v3933_v12  ;;  %3182 = vmatpush3.bf16.msra.mxu0 %v3608_v51 }
 0x151   : > { %3183 = vmatprep.subr.bf16.mxu0 %v3610_v48 }
 0x152   : > { %3308 = vmatpush3.bf16.msra.mxu1 %v3609_v52  ;;  %v2846_v52 = vunpack.c.l.bf16 %v2845_v40 }
 0x153   : > { %3309 = vmatprep.subr.bf16.mxu1 %v3611_v53 }
 0x154   : > { %3184 = vmatpush3.bf16.msra.mxu0 %v3610_v48 }
 0x155   : > { %3294 = vmatmul.mubr.bf16.gmra.mrb[4].mxu1 %v3935_v14  ;;  %3185 = vmatprep.subr.bf16.mxu0 %v3612_v54 }
 0x156   : > { %3310 = vmatpush3.bf16.msra.mxu1 %v3611_v53  ;;  %3297 = vmatprep.mubr.bf16.mxu1 %v3943_v19 }
 0x157   : > { %3170 = vmatmul.mubr.bf16.gmra.mrb[28].mxu0 %v3941_v18  ;;  %3311 = vmatprep.subr.bf16.mxu1 %v3613_v55 }
 0x158   : > { %3173 = vmatprep.mubr.bf16.mxu0 %v3957_v31  ;;  %3186 = vmatpush3.bf16.msra.mxu0 %v3612_v54 }
 0x159   : > { %3187 = vmatprep.subr.bf16.mxu0 %v3614_v56 }
 0x15a   : > { %3312 = vmatpush3.bf16.msra.mxu1 %v3613_v55  ;;  %v2851_v55 = vunpack.c.h.bf16 %v2876_v39 }
 0x15b   : > { %3313 = vmatprep.subr.bf16.mxu1 %v3615_v57 }
 0x15c   : > { %3188 = vmatpush3.bf16.msra.mxu0 %v3614_v56 }
 0x15d   : > { %3298 = vmatmul.mubr.bf16.gmra.mrb[8].mxu1 %v3959_v33  ;;  %3189 = vmatprep.subr.bf16.mxu0 %v3616_v58 }
 0x15e   : > { %3314 = vmatpush3.bf16.msra.mxu1 %v3615_v57  ;;  %3301 = vmatprep.mubr.bf16.mxu1 %v1819_v2 }
 0x15f   : > { %3174 = vmatmul.mubr.bf16.gmra.mrb[32].mxu0 %v3965_v35  ;;  %3315 = vmatprep.subr.bf16.mxu1 %v3617_v63 }
 0x160   : > { %3190 = vmatpush3.bf16.msra.mxu0 %v3616_v58  ;;  %3193 = vmatprep.mubr.bf16.mxu0 %v3887_v45  ;;  %v3621_v45 = vld [vmem:[%s4188_s3 + $0x200] sm:$0xff]  }
 0x161   : > { %3191 = vmatprep.subr.bf16.mxu0 %v3618_v3 }
 0x162   : > { %3316 = vmatpush3.bf16.msra.mxu1 %v3617_v63 }
 0x163   : > { %3317 = vmatprep.subr.bf16.mxu1 %v3619_v4 }
 0x164   : > { %3192 = vmatpush3.bf16.msra.mxu0 %v3618_v3 }
 0x165   : > { %3302 = vmatmul.mubr.bf16.gmra.mrb[12].mxu1 %v1820_v9 }
 0x166   : > { %3318 = vmatpush3.bf16.msra.mxu1 %v3619_v4  ;;  %3321 = vmatprep.mubr.bf16.mxu1 %v2015_v13  ;;  %v2878_v4 = vld [vmem:[%s4109_s9 + $0x18] sm:$0xff]  }
 0x167   : > { %3194 = vmatmul.mubr.bf16.vlgmr.msra.gmra.mrb[20].mxu0 %v3895_v49  ;;  %3319 = vmatprep.subr.bf16.mxu1 %v3620_v11  ;;  %v3623_v49 = vld [vmem:[%s4188_s3 + $0x210] sm:$0xff]   ;;  %v2858_v15 = vunpack.c.l.bf16 %v2878_v4 }
 0x168   : > { %3197 = vmatprep.mubr.bf16.mxu0 %v3911_v61  ;;  %v2006_v61 = vld [vmem:[#allocation2 + $0x81] sm:$0xff] }
 0x169   : > { %v2018_v24 = vpack.c.bf16 %v2006_v61, %v2005_v23 }
 0x16a   : > { %3320 = vmatpush3.bf16.msra.mxu1 %v3620_v11 }
 0x16b   : > { %3337 = vmatprep.subr.bf16.mxu1 %v3621_v45 }
 0x16d   : > { %3322 = vmatmul.mubr.bf16.vlgmr.msra.gmra.mrb[0].mxu1 %v2016_v20 }
 0x16e   : > { %3338 = vmatpush3.bf16.msra.mxu1 %v3621_v45  ;;  %3325 = vmatprep.mubr.bf16.mxu1 %v3847_v8  ;;  %v3625_v8 = vld [vmem:[%s4188_s3 + $0x220] sm:$0xff]  }
 0x16f   : > { %3198 = vmatmul.mubr.bf16.gmra.mrb[24].mxu0 %v3919_v1  ;;  %3339 = vmatprep.subr.bf16.mxu1 %v3622_v21  ;;  %v2009_v1 = vld [vmem:[#allocation2 + $0xa9] sm:$0xff] }
 0x170   : > { %3201 = vmatprep.mubr.bf16.mxu0 %v3935_v14  ;;  %v2020_v14 = vpack.c.bf16 %v3860_v17, %v2009_v1  ;;  %v3628_v17 = vld [vmem:[%s4188_s3 + $0x238] sm:$0xff]  }
 0x172   : > { %3340 = vmatpush3.bf16.msra.mxu1 %v3622_v21 }
 0x173   : > { %3341 = vmatprep.subr.bf16.mxu1 %v3623_v49 }
 0x175   : > { %3326 = vmatmul.mubr.bf16.gmra.mrb[4].mxu1 %v2018_v24 }
 0x176   : > { %3342 = vmatpush3.bf16.msra.mxu1 %v3623_v49  ;;  %3329 = vmatprep.mubr.bf16.mxu1 %v3867_v22  ;;  %v3627_v22 = vld [vmem:[%s4188_s3 + $0x230] sm:$0xff]   ;;  %v2854_v49 = vunpack.c.l.bf16 %v2877_v7 }
 0x177   : > { %3202 = vmatmul.mubr.bf16.gmra.mrb[28].mxu0 %v3943_v19  ;;  %3343 = vmatprep.subr.bf16.mxu1 %v3624_v25 }
 0x178   : > { %3205 = vmatprep.mubr.bf16.mxu0 %v3959_v33 }
 0x17a   : > { %3344 = vmatpush3.bf16.msra.mxu1 %v3624_v25  ;;  %v2859_v25 = vunpack.c.h.bf16 %v2878_v4 }
 0x17b   : > { %3345 = vmatprep.subr.bf16.mxu1 %v3625_v8 }
 0x17d   : > { %3330 = vmatmul.mubr.bf16.gmra.mrb[8].mxu1 %v2020_v14 }
 0x17e   : > { %3346 = vmatpush3.bf16.msra.mxu1 %v3625_v8  ;;  %3333 = vmatprep.mubr.bf16.mxu1 %v3885_v43  ;;  %v2216_v43 = vld [vmem:[#allocation2 + $0xe2] sm:$0xff] }
 0x17f   : > { %3206 = vmatmul.mubr.bf16.gmra.mrb[32].mxu0 %v1819_v2  ;;  %3347 = vmatprep.subr.bf16.mxu1 %v3626_v26 }
 0x182   : > { %3348 = vmatpush3.bf16.msra.mxu1 %v3626_v26  ;;  %v2855_v26 = vunpack.c.h.bf16 %v2877_v7 }
 0x183   : > { %3349 = vmatprep.subr.bf16.mxu1 %v3627_v22 }
 0x185   : > { %3334 = vmatmul.mubr.bf16.gmra.mrb[12].mxu1 %v3883_v42  ;;  %v2215_v42 = vld [vmem:[#allocation2 + $0xda] sm:$0xff] }
 0x186   : > { %3350 = vmatpush3.bf16.msra.mxu1 %v3627_v22  ;;  %3353 = vmatprep.mubr.bf16.mxu1 %v3909_v59  ;;  %v2224_v19 = vpack.c.bf16 %v2216_v43, %v2215_v42 }
 0x187   : > { %3351 = vmatprep.subr.bf16.mxu1 %v3628_v17 }
 0x18a   : > { %3352 = vmatpush3.bf16.msra.mxu1 %v3628_v17 }
 0x18d   : > { %3354 = vmatmul.mubr.bf16.vlgmr.msra.gmra.mrb[0].mxu1 %v3917_v0 }
 0x18e   : > { %3357 = vmatprep.mubr.bf16.mxu1 %v3933_v12 }
 0x195   : > { %3358 = vmatmul.mubr.bf16.gmra.mrb[4].mxu1 %v3941_v18 }
 0x196   : > { %3361 = vmatprep.mubr.bf16.mxu1 %v3957_v31 }
 0x19d   : > { %3362 = vmatmul.mubr.bf16.gmra.mrb[8].mxu1 %v3965_v35 }
 0x19e   : > { %3365 = vmatprep.mubr.bf16.mxu1 %v3978_v44  ;;  %v4116_v44 = vld [vmem:[%s4189_s4] ss:$0 sm:$0xff] }
 0x1a5   : > { %3366 = vmatmul.mubr.bf16.gmra.mrb[12].mxu1 %v2224_v19  ;;  %v2880_v19 = vld [vmem:[%s4109_s9 + $0x28] sm:$0xff]  }
 0x1a6   : > { %v2866_v39 = vunpack.c.l.bf16 %v2880_v19 }
 0x23a   : > { %v3195_v59 = vpop.f32.mrb[20].mxu0 }
 0x23b   : > { %v1313_v27 = vpop.f32.mrb[21].mxu0 }
 0x23c   : > { %v3196_v0 = vpop.f32.mrb[22].mxu0 }
 0x23d   : > { %v1316_v28 = vpop.f32.mrb[23].mxu0 }
 0x242   : > { %v3199_v12 = vpop.f32.mrb[24].mxu0 }
 0x243   : > { %v1329_v29 = vpop.f32.mrb[25].mxu0 }
 0x244   : > { %v3200_v18 = vpop.f32.mrb[26].mxu0 }
 0x245   : > { %v4085_v30 = vpop.f32.mrb[27].mxu0 }
 0x24a   : > { %v4087_v31 = vpop.f32.mrb[28].mxu0 }
 0x24b   : > { %v4091_v32 = vpop.f32.mrb[29].mxu0 }
 0x24c   : > { %v4093_v33 = vpop.f32.mrb[30].mxu0 }
 0x24d   : > { %v4095_v34 = vpop.f32.mrb[31].mxu0 }
 0x252   : > { %v4098_v35 = vpop.f32.mrb[32].mxu0 }
 0x253   : > { %v4100_v36 = vpop.f32.mrb[33].mxu0 }
 0x254   : > { %v4102_v37 = vpop.f32.mrb[34].mxu0 }
 0x255   : > { %v4104_v38 = vpop.f32.mrb[35].mxu0 }
 0x260   : > { %v3355_v41 = vpop.f32.mrb[0].mxu1 }
 0x261   : > { %v3369_v46 = vadd.f32 %v3355_v41, %v3195_v59  ;;  %v2324_v50 = vpop.f32.mrb[1].mxu1 }
 0x262   : > { %v3370_v51 = vadd.f32 %v2324_v50, %v1313_v27  ;;  %v3356_v48 = vpop.f32.mrb[2].mxu1 }
 0x263   : > { %v2412_v53 = vadd.f32 %v3369_v46, %v4116_v44  ;;  %v3371_v54 = vadd.f32 %v3356_v48, %v3196_v0  ;;  %v2327_v56 = vpop.f32.mrb[3].mxu1  ;;  %v2879_v0 = vld [vmem:[%s4109_s9 + $0x20] sm:$0xff]   ;;  %v2867_v48 = vunpack.c.h.bf16 %v2880_v19 }
 0x264   : > { %v2410_v57 = vadd.f32 %v3370_v51, %v4116_v44  ;;  %v3372_v58 = vadd.f32 %v2327_v56, %v1316_v28 }
 0x265   : > { %v2460_v62 = vadd.f32 %v2850_v47, %v2412_v53  ;;  %v2413_v63 = vadd.f32 %v3371_v54, %v4116_v44  ;;  %v2862_v47 = vunpack.c.l.bf16 %v2879_v0 }
 0x266   : > { %v2458_v2 = vadd.f32 %v2846_v52, %v2410_v57  ;;  %v2411_v3 = vadd.f32 %v3372_v58, %v4116_v44 }
 0x267   : > { %v2476_v5 = vmax.f32 %v2460_v62, 0.0  ;;  %v2461_v6 = vadd.f32 %v2851_v55, %v2413_v63  ;;  %v2863_v55 = vunpack.c.h.bf16 %v2879_v0  ;;  %v2881_v63 = vld [vmem:[%s4109_s9 + $0x30] sm:$0xff]  }
 0x268   : > { %v2474_v9 = vmax.f32 %v2458_v2, 0.0  ;;  %v2459_v10 = vadd.f32 %v2847_v60, %v2411_v3  ;;  %v3359_v11 = vpop.f32.mrb[4].mxu1  ;;  %v2882_v60 = vld [vmem:[%s4109_s9 + $0x38] sm:$0xff]  }
 0x269   : > { %2492 = vst [vmem:[%s4124_s15 + $0x10] sm:$0xff] %v2476_v5  ;;  %v2477_v13 = vmax.f32 %v2461_v6, 0.0  ;;  %v3373_v45 = vadd.f32 %v3359_v11, %v3199_v12  ;;  %v2340_v16 = vpop.f32.mrb[5].mxu1  ;;  %v2874_v6 = vunpack.c.l.bf16 %v2882_v60  ;;  %v2870_v11 = vunpack.c.l.bf16 %v2881_v63 }
 0x26a   : > { %2490 = vst [vmem:[%s4124_s15] sm:$0xff] %v2474_v9  ;;  %v2475_v20 = vmax.f32 %v2459_v10, 0.0  ;;  %v3374_v21 = vadd.f32 %v2340_v16, %v1329_v29  ;;  %v3360_v61 = vpop.f32.mrb[6].mxu1  ;;  %v2875_v16 = vunpack.c.h.bf16 %v2882_v60 }
 0x26b   : > { %2493 = vst [vmem:[%s4124_s15 + $0x18] sm:$0xff] %v2477_v13  ;;  %v2416_v23 = vadd.f32 %v3373_v45, %v4116_v44  ;;  %v3375_v24 = vadd.f32 %v3360_v61, %v3200_v18  ;;  %v2343_v8 = vpop.f32.mrb[7].mxu1 }
 0x26c   : > { %2491 = vst [vmem:[%s4124_s15 + $0x8] sm:$0xff] %v2475_v20  ;;  %v2414_v1 = vadd.f32 %v3374_v21, %v4116_v44  ;;  %v3376_v14 = vadd.f32 %v2343_v8, %v4085_v30 }
 0x26d   : > { %v2464_v22 = vadd.f32 %v2858_v15, %v2416_v23  ;;  %v2417_v17 = vadd.f32 %v3375_v24, %v4116_v44 }
 0x26e   : > { %v2462_v42 = vadd.f32 %v2854_v49, %v2414_v1  ;;  %v2415_v43 = vadd.f32 %v3376_v14, %v4116_v44  ;;  %v2871_v49 = vunpack.c.h.bf16 %v2881_v63 }
 0x26f   : > { %v2480_v59 = vmax.f32 %v2464_v22, 0.0  ;;  %v2465_v27 = vadd.f32 %v2859_v25, %v2417_v17 }
 0x270   : > { %v2478_v28 = vmax.f32 %v2462_v42, 0.0  ;;  %v2463_v12 = vadd.f32 %v2855_v26, %v2415_v43  ;;  %v3363_v29 = vpop.f32.mrb[8].mxu1 }
 0x271   : > { %2496 = vst [vmem:[%s4124_s15 + $0x30] sm:$0xff] %v2480_v59  ;;  %v2481_v18 = vmax.f32 %v2465_v27, 0.0  ;;  %v3377_v30 = vadd.f32 %v3363_v29, %v4087_v31  ;;  %v2356_v40 = vpop.f32.mrb[9].mxu1 }
 0x272   : > { %2494 = vst [vmem:[%s4124_s15 + $0x20] sm:$0xff] %v2478_v28  ;;  %v2479_v41 = vmax.f32 %v2463_v12, 0.0  ;;  %v3378_v46 = vadd.f32 %v2356_v40, %v4091_v32  ;;  %v3364_v50 = vpop.f32.mrb[10].mxu1 }
 0x273   : > { %2497 = vst [vmem:[%s4124_s15 + $0x38] sm:$0xff] %v2481_v18  ;;  %v2420_v51 = vadd.f32 %v3377_v30, %v4116_v44  ;;  %v3379_v52 = vadd.f32 %v3364_v50, %v4093_v33  ;;  %v2359_v53 = vpop.f32.mrb[11].mxu1 }
 0x274   : > { %2495 = vst [vmem:[%s4124_s15 + $0x28] sm:$0xff] %v2479_v41  ;;  %v2418_v31 = vadd.f32 %v3378_v46, %v4116_v44  ;;  %v3380_v54 = vadd.f32 %v2359_v53, %v4095_v34 }
 0x275   : > { %v2468_v56 = vadd.f32 %v2866_v39, %v2420_v51  ;;  %v2421_v32 = vadd.f32 %v3379_v52, %v4116_v44 }
 0x276   : > { %v2466_v57 = vadd.f32 %v2862_v47, %v2418_v31  ;;  %v2419_v58 = vadd.f32 %v3380_v54, %v4116_v44 }
 0x277   : > { %v2484_v62 = vmax.f32 %v2468_v56, 0.0  ;;  %v2469_v33 = vadd.f32 %v2867_v48, %v2421_v32 }
 0x278   : > { %v2482_v2 = vmax.f32 %v2466_v57, 0.0  ;;  %v2467_v3 = vadd.f32 %v2863_v55, %v2419_v58  ;;  %v3367_v4 = vpop.f32.mrb[12].mxu1 }
 0x279   : > { %2500 = vst [vmem:[%s4124_s15 + $0x50] sm:$0xff] %v2484_v62  ;;  %v2485_v5 = vmax.f32 %v2469_v33, 0.0  ;;  %v3381_v34 = vadd.f32 %v3367_v4, %v4098_v35  ;;  %v2372_v7 = vpop.f32.mrb[13].mxu1 }
 0x27a   : > { %2498 = vst [vmem:[%s4124_s15 + $0x40] sm:$0xff] %v2482_v2  ;;  %v2483_v9 = vmax.f32 %v2467_v3, 0.0  ;;  %v3382_v10 = vadd.f32 %v2372_v7, %v4100_v36  ;;  %v3368_v13 = vpop.f32.mrb[14].mxu1 }
 0x27b   : > { %2501 = vst [vmem:[%s4124_s15 + $0x58] sm:$0xff] %v2485_v5  ;;  %v2424_v45 = vadd.f32 %v3381_v34, %v4116_v44  ;;  %v3383_v15 = vadd.f32 %v3368_v13, %v4102_v37  ;;  %v2375_v20 = vpop.f32.mrb[15].mxu1 }
 0x27c   : > { %2499 = vst [vmem:[%s4124_s15 + $0x48] sm:$0xff] %v2483_v9  ;;  %v2422_v35 = vadd.f32 %v3382_v10, %v4116_v44  ;;  %v3384_v21 = vadd.f32 %v2375_v20, %v4104_v38 }
 0x27d   : > { %v2472_v36 = vadd.f32 %v2874_v6, %v2424_v45  ;;  %v2425_v61 = vadd.f32 %v3383_v15, %v4116_v44 }
 0x27e   : > { %v2470_v23 = vadd.f32 %v2870_v11, %v2422_v35  ;;  %v2423_v24 = vadd.f32 %v3384_v21, %v4116_v44 }
 0x27f   : > { %v2488_v25 = vmax.f32 %v2472_v36, 0.0  ;;  %v2473_v8 = vadd.f32 %v2875_v16, %v2425_v61 }
 0x280   : > { %v2486_v37 = vmax.f32 %v2470_v23, 0.0  ;;  %v2471_v1 = vadd.f32 %v2871_v49, %v2423_v24 }
 0x281   : > { %2504 = vst [vmem:[%s4124_s15 + $0x70] sm:$0xff] %v2488_v25  ;;  %v2489_v14 = vmax.f32 %v2473_v8, 0.0 }
 0x282   : > { %2502 = vst [vmem:[%s4124_s15 + $0x60] sm:$0xff] %v2486_v37  ;;  %v2487_v26 = vmax.f32 %v2471_v1, 0.0 }
 0x283   : > { %2505 = vst [vmem:[%s4124_s15 + $0x78] sm:$0xff] %v2489_v14 }
 0x284   : > { %2503 = vst [vmem:[%s4124_s15 + $0x68] sm:$0xff] %v2487_v26 }
 0x285 PF: > { %s15_s22 = sadd.s32 1, %s3667_s22   ;;  %s4191_s18 = smov %s3659_s20 }
 0x286   : > { %p12_p8 = scmp.ge.s32.totalorder %s15_s22, 6   ;;  %s4192_s19 = smov %s3663_s21 }
 0x287   : > { %s4193_s20 = smov %s4196_s23  ;;  %s4194_s21 = smov %s4200_s24 }
 0x288   :  { %14 = sbr.rel (!%p12_p8) target bundleno = 3 (0x3), region = 83 }

</bundles_post_ra>
